<compile_context>
chip_gen: v7x
topology: tpu7x:2x2x1
jax: 0.10.0
libtpu: 0.0.40
codegen_flags: <defaults>
</compile_context>

<pallas_src>
import functools

import jax
import jax.numpy as jnp
from jax import lax
from jax.experimental import pallas as pl
from jax.experimental.pallas import tpu as pltpu

_NEG = -1e30  # large finite negative (avoids -inf -> NaN on generalized masks)


def _round_up(x, m):
    return ((x + m - 1) // m) * m


def _pick_row_tile(n):
    for t in (512, 256, 128):
        if n % t == 0:
            return t
    return n  # single full block (allowed: equals full array dim)


# ---------------------------------------------------------------------------
# Kernel A: fused qkv 1x1-conv (= per-token matmul) + head split.
# Writes q/k/v directly in (B, head, S, d) layout so no XLA split/transpose
# pass is needed between the two kernels.
# ---------------------------------------------------------------------------
def qkv_split_kernel(x_ref, w_ref, b_ref, q_ref, k_ref, v_ref, *,
                     head, dqk, dv, qk_dim):
    acc = jnp.dot(x_ref[0], w_ref[...], preferred_element_type=jnp.float32)
    acc = acc + b_ref[...]
    for h in range(head):  # static loop; static lane slices of the accumulator
        q_ref[0, h] = acc[:, h * dqk:(h + 1) * dqk].astype(q_ref.dtype)
        k_ref[0, h] = acc[:, qk_dim + h * dqk:
                          qk_dim + (h + 1) * dqk].astype(k_ref.dtype)
        v_ref[0, h] = acc[:, 2 * qk_dim + h * dv:
                          2 * qk_dim + (h + 1) * dv].astype(v_ref.dtype)


# ---------------------------------------------------------------------------
# Kernel B: flash-style causal attention (all heads batched) + fused output
# projection, written channel-major.
# ---------------------------------------------------------------------------
def flash_attn_proj_kernel(q_ref, k_ref, v_ref, wp_ref, bp_ref, o_ref,
                           m_sc, l_sc, acc_sc, *, block):
    qi = pl.program_id(1)
    ki = pl.program_id(2)

    @pl.when(ki == 0)
    def _init():
        m_sc[...] = jnp.full(m_sc.shape, _NEG, m_sc.dtype)
        l_sc[...] = jnp.zeros(l_sc.shape, l_sc.dtype)
        acc_sc[...] = jnp.zeros(acc_sc.shape, acc_sc.dtype)

    def _scores():
        # Batched over heads; contraction on the last dim.  The softmax scale
        # was folded into Wqkv's q columns at trace time.
        return jnp.einsum('htd,hsd->hts', q_ref[0], k_ref[0],
                          preferred_element_type=jnp.float32)

    def _accumulate(s):
        m_prev = m_sc[...]
        m_new = jnp.maximum(m_prev, s.max(axis=-1, keepdims=True))
        alpha = jnp.exp(m_prev - m_new)
        # Masked entries (diagonal block only): exp(_NEG - m_new) underflows
        # to exactly 0, so no second masking pass is needed.
        p = jnp.exp(s - m_new)
        l_sc[...] = alpha * l_sc[...] + p.sum(axis=-1, keepdims=True)
        acc_sc[...] = alpha * acc_sc[...] + jnp.einsum(
            'hts,hsd->htd', p.astype(v_ref.dtype), v_ref[0],
            preferred_element_type=jnp.float32)
        m_sc[...] = m_new

    @pl.when(ki < qi)
    def _off_diagonal():       # fully unmasked: no iota/compare/select work
        _accumulate(_scores())

    @pl.when(ki == qi)
    def _diagonal_and_finalize():
        s = _scores()
        row = lax.broadcasted_iota(jnp.int32, (block, block), 0)
        col = lax.broadcasted_iota(jnp.int32, (block, block), 1)
        _accumulate(jnp.where(row >= col, s, _NEG))

        # ki == qi is the last contributing kv step for this q block ->
        # finalize here; ki > qi steps are fully empty (their K/V index maps
        # are clamped, so they issue no DMAs either).
        inv_l = pl.reciprocal(l_sc[...], approx=True)          # EUP slot
        o_heads = (acc_sc[...] * inv_l).astype(wp_ref.dtype)   # (head, blk, dv)
        # Fused output projection, produced channel-major:
        #   out_cm[c, t] = sum_{h,d} Wp[h, c, d] * o[h, t, d]
        out_cm = jnp.einsum('hcd,htd->hct', wp_ref[...], o_heads,
                            preferred_element_type=jnp.float32).sum(axis=0)
        o_ref[0] = (out_cm + bp_ref[...]).astype(o_ref.dtype)

    # TODO(synk): a scalar-prefetched lower-triangular (b, qi, ki) schedule
    # would also remove the ki > qi grid steps (~0.35us each) entirely, at the
    # cost of losing the "parallel" megacore annotation on the B/qi axes.


# ---------------------------------------------------------------------------
# Wrapper
# ---------------------------------------------------------------------------
def mask_attention(x_nchw, wqkv, bqkv, wproj, bproj, *, head, qk_dim, v_dim,
                   compute_dtype=jnp.bfloat16, block_s=None):
    """Forward of MaskAttention.  Weights are the squeezed/transposed 1x1-conv
    weights: wqkv (Cin, 2*qk_dim+v_dim), wproj (v_dim, Cout)."""
    assert qk_dim % head == 0 and v_dim % head == 0
    B, Cin, H, W = x_nchw.shape
    S = H * W
    Cout = wproj.shape[1]
    dqk = qk_dim // head
    dv = v_dim // head
    Dqkv = 2 * qk_dim + v_dim
    div = dqk ** (-0.5)
    out_dtype = x_nchw.dtype

    # Fold the attention scale into the q columns of the qkv projection
    # (zero in-kernel cost; replaces head*S^2 VPU multiplies).
    wqkv_s = jnp.concatenate([wqkv[:, :qk_dim] * div, wqkv[:, qk_dim:]], axis=1)
    bqkv_s = jnp.concatenate([bqkv[:, :qk_dim] * div, bqkv[:, qk_dim:]], axis=1)

    # ---- Kernel A: qkv projection + head split -> (B, head, S, d) ----------
    x_tok = x_nchw.reshape(B, Cin, S).transpose(0, 2, 1).astype(compute_dtype)
    wqkv_c = wqkv_s.astype(compute_dtype)
    bqkv_f = bqkv_s.astype(jnp.float32).reshape(1, Dqkv)

    ts = _pick_row_tile(S)
    itemsize = jnp.dtype(compute_dtype).itemsize
    flops_a = 2 * B * S * Cin * Dqkv
    bytes_a = int((B * S * (Cin + Dqkv) + Cin * Dqkv + Dqkv) * itemsize)

    q, k, v = pl.pallas_call(
        functools.partial(qkv_split_kernel, head=head, dqk=dqk, dv=dv,
                          qk_dim=qk_dim),
        out_shape=(jax.ShapeDtypeStruct((B, head, S, dqk), compute_dtype),
                   jax.ShapeDtypeStruct((B, head, S, dqk), compute_dtype),
                   jax.ShapeDtypeStruct((B, head, S, dv), compute_dtype)),
        grid_spec=pltpu.PrefetchScalarGridSpec(
            num_scalar_prefetch=0,
            grid=(B, S // ts),
            in_specs=[
                pl.BlockSpec((1, ts, Cin), lambda b, i: (b, i, 0)),
                pl.BlockSpec((Cin, Dqkv), lambda b, i: (0, 0)),
                pl.BlockSpec((1, Dqkv), lambda b, i: (0, 0)),
            ],
            out_specs=(
                pl.BlockSpec((1, head, ts, dqk), lambda b, i: (b, 0, i, 0)),
                pl.BlockSpec((1, head, ts, dqk), lambda b, i: (b, 0, i, 0)),
                pl.BlockSpec((1, head, ts, dv), lambda b, i: (b, 0, i, 0)),
            ),
        ),
        compiler_params=pltpu.CompilerParams(
            dimension_semantics=("parallel", "parallel")),
        cost_estimate=pl.CostEstimate(flops=int(flops_a), transcendentals=0,
                                      bytes_accessed=bytes_a),
    )(x_tok, wqkv_c, bqkv_f)

    # ---- Kernel B: flash attention + fused channel-major output proj -------
    Cout_p = _round_up(Cout, 8)     # sublane pad only; store lanes = block_s
    wp = jnp.pad(wproj.reshape(head, dv, Cout),
                 ((0, 0), (0, 0), (0, Cout_p - Cout)))
    wp_cm = jnp.transpose(wp, (0, 2, 1)).astype(compute_dtype)  # (head,Cout_p,dv)
    bp_cm = jnp.pad(bproj.reshape(Cout), (0, Cout_p - Cout)
                    ).astype(jnp.float32).reshape(Cout_p, 1)

    if block_s is None:
        # Demo-sized default.  Production: 256 (v5e/v7x) / 512 (v6e), 128-aligned.
        block_s = 128 if S % 128 == 0 else S
    assert S % block_s == 0, "block_s must divide S"
    nq = nk = S // block_s

    pad_l = lambda n: _round_up(n, 128)
    vmem_est = (
        2 * head * block_s * (2 * pad_l(dqk) + pad_l(dv)) * itemsize   # dbl-buf q/k/v
        + 2 * Cout_p * pad_l(block_s) * jnp.dtype(out_dtype).itemsize  # dbl-buf out
        + head * block_s * (2 * 128 + pad_l(dv)) * 4                   # m/l/acc scratch
        + 3 * head * block_s * pad_l(block_s) * 4                      # live score temps
        + 2 * head * Cout_p * pad_l(dv) * itemsize)                    # wp
    cparams = dict(dimension_semantics=("parallel", "parallel", "arbitrary"))
    if vmem_est > 32 * 1024 * 1024:
        cparams["vmem_limit_bytes"] = int(min(vmem_est * 3 // 2,
                                              112 * 1024 * 1024))

    flops_b = 2 * B * head * (S * S // 2) * (dqk + dv) + 2 * B * S * v_dim * Cout_p
    transc_b = B * head * (S * S // 2)
    bytes_b = int(itemsize * (B * S * qk_dim
                              + B * (nq * (nq + 1) // 2) * block_s * (qk_dim + v_dim))
                  + jnp.dtype(out_dtype).itemsize * B * Cout_p * S)

    out_cm = pl.pallas_call(
        functools.partial(flash_attn_proj_kernel, block=block_s),
        out_shape=jax.ShapeDtypeStruct((B, Cout_p, S), out_dtype),
        grid_spec=pltpu.PrefetchScalarGridSpec(
            num_scalar_prefetch=0,
            grid=(B, nq, nk),
            in_specs=[
                pl.BlockSpec((1, head, block_s, dqk),
                             lambda b, qi, ki: (b, 0, qi, 0)),
                # Clamped kv index: causally-skipped blocks re-use the previous
                # block index -> Pallas issues no DMA for them.
                pl.BlockSpec((1, head, block_s, dqk),
                             lambda b, qi, ki: (b, 0, jnp.minimum(ki, qi), 0)),
                pl.BlockSpec((1, head, block_s, dv),
                             lambda b, qi, ki: (b, 0, jnp.minimum(ki, qi), 0)),
                pl.BlockSpec((head, Cout_p, dv), lambda b, qi, ki: (0, 0, 0)),
                pl.BlockSpec((Cout_p, 1), lambda b, qi, ki: (0, 0)),
            ],
            out_specs=pl.BlockSpec((1, Cout_p, block_s),
                                   lambda b, qi, ki: (b, 0, qi)),
            scratch_shapes=[
                pltpu.VMEM((head, block_s, 1), jnp.float32),   # running max
                pltpu.VMEM((head, block_s, 1), jnp.float32),   # running sum
                pltpu.VMEM((head, block_s, dv), jnp.float32),  # output acc
            ],
        ),
        compiler_params=pltpu.CompilerParams(**cparams),
        cost_estimate=pl.CostEstimate(flops=int(flops_b),
                                      transcendentals=int(transc_b),
                                      bytes_accessed=bytes_b),
    )(q, k, v, wp_cm, bp_cm)

    # Channel-major output: only a sublane-pad slice + free reshape remain
    # (both no-ops when out_ch is already a multiple of 8).
    return out_cm[:, :Cout, :].reshape(B, Cout, H, W)


# ---------------------------------------------------------------------------
# Plain-JAX reference (mirror of the PyTorch forward) for correctness check
# ---------------------------------------------------------------------------
def mask_attention_reference(x_nchw, wqkv, bqkv, wproj, bproj,
                             *, head, qk_dim, v_dim):
    B, Cin, H, W = x_nchw.shape
    S = H * W
    div = (qk_dim // head) ** (-0.5)
    dqk = qk_dim // head
    dv = v_dim // head

    x = x_nchw.reshape(B, Cin, S).transpose(0, 2, 1)       # (B, S, Cin)
    qkv = x @ wqkv + bqkv                                  # (B, S, Dqkv)
    q, k, v = (qkv[..., :qk_dim], qkv[..., qk_dim:2 * qk_dim],
               qkv[..., 2 * qk_dim:])
    q = q.reshape(B, S, head, dqk).transpose(0, 2, 1, 3)
    k = k.reshape(B, S, head, dqk).transpose(0, 2, 1, 3)
    v = v.reshape(B, S, head, dv).transpose(0, 2, 1, 3)

    mask = jnp.tril(jnp.ones((S, S), jnp.float32))
    logits = jnp.einsum("bhqd,bhkd->bhqk", q, k) * div
    logits = jnp.where(mask == 0, -jnp.inf, logits)
    attn = jax.nn.softmax(logits, axis=-1)
    attn = jnp.where(mask == 0, 0.0, attn)
    out = jnp.einsum("bhqk,bhkd->bhqd", attn, v)
    out = out.transpose(0, 2, 1, 3).reshape(B, S, head * dv)
    out = out @ wproj + bproj
    return out.transpose(0, 2, 1).reshape(B, -1, H, W)


if __name__ == "__main__":
    B, in_ch, H, W = 2, 4, 16, 16          # S = 256 -> 2 q-blocks x 2 kv-blocks
    head, qk_dim, v_dim, out_ch = 2, 8, 8, 4

    key = jax.random.PRNGKey(0)
    k1, k2, k3, k4, k5 = jax.random.split(key, 5)

    x = jax.random.normal(k1, (B, in_ch, H, W), jnp.float32)
    # nn.Conv2d weight (Dout, Cin, 1, 1) stored squeezed+transposed as (Cin, Dout).
    wqkv = jax.random.normal(k2, (in_ch, 2 * qk_dim + v_dim), jnp.float32) * 0.2
    bqkv = jax.random.normal(k3, (1, 2 * qk_dim + v_dim), jnp.float32) * 0.1
    wproj = jax.random.normal(k4, (v_dim, out_ch), jnp.float32) * 0.2
    bproj = jax.random.normal(k5, (1, out_ch), jnp.float32) * 0.1

    ref = mask_attention_reference(x, wqkv, bqkv, wproj, bproj,
                                   head=head, qk_dim=qk_dim, v_dim=v_dim)

    # f32 compute path (tolerance allows the approx EUP reciprocal).
    out_f32 = mask_attention(x, wqkv, bqkv, wproj, bproj,
                             head=head, qk_dim=qk_dim, v_dim=v_dim,
                             compute_dtype=jnp.float32)
    jax.block_until_ready(out_f32)
    assert out_f32.shape == (B, out_ch, H, W)
    assert jnp.allclose(out_f32, ref, atol=1e-2, rtol=1e-2), "f32 mismatch"

    # Default bfloat16 matmul-operand path (v5e/v6e/v7x MXU); looser tolerance.
    out_bf16 = mask_attention(x, wqkv, bqkv, wproj, bproj,
                              head=head, qk_dim=qk_dim, v_dim=v_dim)
    jax.block_until_ready(out_bf16)
    assert jnp.allclose(out_bf16, ref, atol=1e-1, rtol=1e-1), "bf16 mismatch"

    print("KERNEL_OK")
</pallas_src>

<mosaic_0001>
module attributes {stable_mosaic.version = 11 : i64} {
  func.func @qkv_split_kernel(%arg0: i32, %arg1: i32, %arg2: memref<1x256x4xf32, #tpu.memory_space<vmem>>, %arg3: memref<4x24xf32, #tpu.memory_space<vmem>>, %arg4: memref<1x24xf32, #tpu.memory_space<vmem>>, %arg5: memref<1x2x256x4xf32, #tpu.memory_space<vmem>>, %arg6: memref<1x2x256x4xf32, #tpu.memory_space<vmem>>, %arg7: memref<1x2x256x4xf32, #tpu.memory_space<vmem>>) attributes {dimension_semantics = [#tpu.dimension_semantics<parallel>, #tpu.dimension_semantics<parallel>], iteration_bounds = array<i64: 2, 1>, scalar_prefetch = 0 : i64, scratch_operands = 0 : i64, tpu.core_type = #tpu.core_type<tc>, window_params = [{transform_indices = @transform_0, window_bounds = array<i64: 1, 256, 4>}, {pipeline_mode = #tpu.pipeline_mode<synchronous>, transform_indices = @transform_1, window_bounds = array<i64: 4, 24>}, {pipeline_mode = #tpu.pipeline_mode<synchronous>, transform_indices = @transform_2, window_bounds = array<i64: 1, 24>}, {transform_indices = @transform_3, window_bounds = array<i64: 1, 2, 256, 4>}, {transform_indices = @transform_4, window_bounds = array<i64: 1, 2, 256, 4>}, {transform_indices = @transform_5, window_bounds = array<i64: 1, 2, 256, 4>}]} {
    %c0 = arith.constant 0 : index
    %c0_0 = arith.constant 0 : index
    %c0_1 = arith.constant 0 : index
    %0 = vector.load %arg2[%c0, %c0_0, %c0_1] : memref<1x256x4xf32, #tpu.memory_space<vmem>>, vector<1x256x4xf32>
    %1 = vector.shape_cast %0 : vector<1x256x4xf32> to vector<256x4xf32>
    %c0_2 = arith.constant 0 : index
    %c0_3 = arith.constant 0 : index
    %2 = vector.load %arg3[%c0_2, %c0_3] : memref<4x24xf32, #tpu.memory_space<vmem>>, vector<4x24xf32>
    %cst = arith.constant dense<0.000000e+00> : vector<256x24xf32>
    %3 = tpu.matmul %1, %2, %cst {dimension_numbers = #tpu.dot_dimension_numbers<[1], [0], [0], [1], [0, 0, 1, 1], [], []>} : vector<256x4xf32>, vector<4x24xf32>, vector<256x24xf32> -> vector<256x24xf32>
    %c0_4 = arith.constant 0 : index
    %c0_5 = arith.constant 0 : index
    %4 = vector.load %arg4[%c0_4, %c0_5] : memref<1x24xf32, #tpu.memory_space<vmem>>, vector<1x24xf32>
    %5 = vector.broadcast %4 : vector<1x24xf32> to vector<256x24xf32>
    %6 = arith.addf %3, %5 : vector<256x24xf32>
    %7 = vector.extract_strided_slice %6 {offsets = [0, 0], sizes = [256, 4], strides = [1, 1]} : vector<256x24xf32> to vector<256x4xf32>
    %c0_6 = arith.constant 0 : index
    %c0_7 = arith.constant 0 : index
    %c0_8 = arith.constant 0 : index
    %c0_9 = arith.constant 0 : index
    %8 = vector.load %arg5[%c0_6, %c0_7, %c0_8, %c0_9] : memref<1x2x256x4xf32, #tpu.memory_space<vmem>>, vector<1x1x256x4xf32>
    %9 = vector.shape_cast %8 : vector<1x1x256x4xf32> to vector<256x4xf32>
    %10 = vector.shape_cast %7 : vector<256x4xf32> to vector<1x1x256x4xf32>
    tpu.vector_store %arg5[%c0_6, %c0_7, %c0_8, %c0_9], %10 {strides = array<i32>} : memref<1x2x256x4xf32, #tpu.memory_space<vmem>>, vector<1x1x256x4xf32>,
    %11 = vector.extract_strided_slice %6 {offsets = [0, 8], sizes = [256, 4], strides = [1, 1]} : vector<256x24xf32> to vector<256x4xf32>
    %c0_10 = arith.constant 0 : index
    %c0_11 = arith.constant 0 : index
    %c0_12 = arith.constant 0 : index
    %c0_13 = arith.constant 0 : index
    %12 = vector.load %arg6[%c0_10, %c0_11, %c0_12, %c0_13] : memref<1x2x256x4xf32, #tpu.memory_space<vmem>>, vector<1x1x256x4xf32>
    %13 = vector.shape_cast %12 : vector<1x1x256x4xf32> to vector<256x4xf32>
    %14 = vector.shape_cast %11 : vector<256x4xf32> to vector<1x1x256x4xf32>
    tpu.vector_store %arg6[%c0_10, %c0_11, %c0_12, %c0_13], %14 {strides = array<i32>} : memref<1x2x256x4xf32, #tpu.memory_space<vmem>>, vector<1x1x256x4xf32>,
    %15 = vector.extract_strided_slice %6 {offsets = [0, 16], sizes = [256, 4], strides = [1, 1]} : vector<256x24xf32> to vector<256x4xf32>
    %c0_14 = arith.constant 0 : index
    %c0_15 = arith.constant 0 : index
    %c0_16 = arith.constant 0 : index
    %c0_17 = arith.constant 0 : index
    %16 = vector.load %arg7[%c0_14, %c0_15, %c0_16, %c0_17] : memref<1x2x256x4xf32, #tpu.memory_space<vmem>>, vector<1x1x256x4xf32>
    %17 = vector.shape_cast %16 : vector<1x1x256x4xf32> to vector<256x4xf32>
    %18 = vector.shape_cast %15 : vector<256x4xf32> to vector<1x1x256x4xf32>
    tpu.vector_store %arg7[%c0_14, %c0_15, %c0_16, %c0_17], %18 {strides = array<i32>} : memref<1x2x256x4xf32, #tpu.memory_space<vmem>>, vector<1x1x256x4xf32>,
    %19 = vector.extract_strided_slice %6 {offsets = [0, 4], sizes = [256, 4], strides = [1, 1]} : vector<256x24xf32> to vector<256x4xf32>
    %c0_18 = arith.constant 0 : index
    %c1 = arith.constant 1 : index
    %c0_19 = arith.constant 0 : index
    %c0_20 = arith.constant 0 : index
    %20 = vector.load %arg5[%c0_18, %c1, %c0_19, %c0_20] : memref<1x2x256x4xf32, #tpu.memory_space<vmem>>, vector<1x1x256x4xf32>
    %21 = vector.shape_cast %20 : vector<1x1x256x4xf32> to vector<256x4xf32>
    %22 = vector.shape_cast %19 : vector<256x4xf32> to vector<1x1x256x4xf32>
    tpu.vector_store %arg5[%c0_18, %c1, %c0_19, %c0_20], %22 {strides = array<i32>} : memref<1x2x256x4xf32, #tpu.memory_space<vmem>>, vector<1x1x256x4xf32>,
    %23 = vector.extract_strided_slice %6 {offsets = [0, 12], sizes = [256, 4], strides = [1, 1]} : vector<256x24xf32> to vector<256x4xf32>
    %c0_21 = arith.constant 0 : index
    %c1_22 = arith.constant 1 : index
    %c0_23 = arith.constant 0 : index
    %c0_24 = arith.constant 0 : index
    %24 = vector.load %arg6[%c0_21, %c1_22, %c0_23, %c0_24] : memref<1x2x256x4xf32, #tpu.memory_space<vmem>>, vector<1x1x256x4xf32>
    %25 = vector.shape_cast %24 : vector<1x1x256x4xf32> to vector<256x4xf32>
    %26 = vector.shape_cast %23 : vector<256x4xf32> to vector<1x1x256x4xf32>
    tpu.vector_store %arg6[%c0_21, %c1_22, %c0_23, %c0_24], %26 {strides = array<i32>} : memref<1x2x256x4xf32, #tpu.memory_space<vmem>>, vector<1x1x256x4xf32>,
    %27 = vector.extract_strided_slice %6 {offsets = [0, 20], sizes = [256, 4], strides = [1, 1]} : vector<256x24xf32> to vector<256x4xf32>
    %c0_25 = arith.constant 0 : index
    %c1_26 = arith.constant 1 : index
    %c0_27 = arith.constant 0 : index
    %c0_28 = arith.constant 0 : index
    %28 = vector.load %arg7[%c0_25, %c1_26, %c0_27, %c0_28] : memref<1x2x256x4xf32, #tpu.memory_space<vmem>>, vector<1x1x256x4xf32>
    %29 = vector.shape_cast %28 : vector<1x1x256x4xf32> to vector<256x4xf32>
    %30 = vector.shape_cast %27 : vector<256x4xf32> to vector<1x1x256x4xf32>
    tpu.vector_store %arg7[%c0_25, %c1_26, %c0_27, %c0_28], %30 {strides = array<i32>} : memref<1x2x256x4xf32, #tpu.memory_space<vmem>>, vector<1x1x256x4xf32>,
    return
  }
  func.func @transform_0(%arg0: i32, %arg1: i32) -> (i32, i32, i32) {
    %c0_i32 = arith.constant 0 : i32
    %c0_i32_0 = arith.constant 0 : i32
    return %arg0, %arg1, %c0_i32 : i32, i32, i32
  }
  func.func @transform_1(%arg0: i32, %arg1: i32) -> (i32, i32) {
    %c0_i32 = arith.constant 0 : i32
    %c0_i32_0 = arith.constant 0 : i32
    %c0_i32_1 = arith.constant 0 : i32
    return %c0_i32, %c0_i32_0 : i32, i32
  }
  func.func @transform_2(%arg0: i32, %arg1: i32) -> (i32, i32) {
    %c0_i32 = arith.constant 0 : i32
    %c0_i32_0 = arith.constant 0 : i32
    %c0_i32_1 = arith.constant 0 : i32
    return %c0_i32, %c0_i32_0 : i32, i32
  }
  func.func @transform_3(%arg0: i32, %arg1: i32) -> (i32, i32, i32, i32) {
    %c0_i32 = arith.constant 0 : i32
    %c0_i32_0 = arith.constant 0 : i32
    %c0_i32_1 = arith.constant 0 : i32
    return %arg0, %c0_i32, %arg1, %c0_i32_0 : i32, i32, i32, i32
  }
  func.func @transform_4(%arg0: i32, %arg1: i32) -> (i32, i32, i32, i32) {
    %c0_i32 = arith.constant 0 : i32
    %c0_i32_0 = arith.constant 0 : i32
    %c0_i32_1 = arith.constant 0 : i32
    return %arg0, %c0_i32, %arg1, %c0_i32_0 : i32, i32, i32, i32
  }
  func.func @transform_5(%arg0: i32, %arg1: i32) -> (i32, i32, i32, i32) {
    %c0_i32 = arith.constant 0 : i32
    %c0_i32_0 = arith.constant 0 : i32
    %c0_i32_1 = arith.constant 0 : i32
    return %arg0, %c0_i32, %arg1, %c0_i32_0 : i32, i32, i32, i32
  }
}

</mosaic_0001>

<bundles_post_ra>
// kernel: tpu_custom_call.1
= control target key start
LH: loop header
LB: loop body
LE: loop exit
PB: predicated region body
PF: predicated region fallthrough
CT: control target
= control target key end

     0   :  { %s1893_s18 = smov 0   ;;  %s1895_s19 = smov 0   ;;  %s2853_s0 = inlined_call_operand.vmem [shape: f32[2,256,4], index: 0, kind: input, shape index: {}]   ;;  %s2854_s1 = inlined_call_operand.vmem [shape: f32[4,24], index: 1, kind: input, shape index: {}]   ;;  %s2855_s2 = inlined_call_operand.vmem [shape: f32[1,24], index: 2, kind: input, shape index: {}]   ;;  %s2856_s3 = inlined_call_operand.vmem [shape: f32[2,2,256,4], index: 3, kind: output, shape index: {0}]   ;;  %s2857_s4 = inlined_call_operand.vmem [shape: f32[2,2,256,4], index: 4, kind: output, shape index: {1}]   ;;  %s2858_s5 = inlined_call_operand.vmem [shape: f32[2,2,256,4], index: 5, kind: output, shape index: {2}]  }
   0x1   :  { %s1897_s20 = smov 0  }
   0x2 LB: > { %s28_s21 = sadd.s32 1, %s1852_s19  ;;  %p1575_p0 = scmp.ge.s32.totalorder %s1856_s20, 1  ;;  %s1856_s20 = sphi %s1897_s20, %s16_s20   ;;  %s1852_s19 = sphi %s1895_s19, %s2860_s19   ;;  %s1848_s18 = sphi %s1893_s18, %s2859_s18  }
   0x3   : > { %p30_p1 = scmp.ge.s32.totalorder %s28_s21, 2  ;;  %p217_p2 = scmp.lt.s32.totalorder %s1856_s20, 3 }
   0x5   : > { %s2862_s21 = smov (%p30_p1, %s28_s21), 0  ;;  %p218_p3 = pnand %p1575_p0, %p217_p2 }
   0x6   : > { %v343_v0 = vld [vmem:[%s2854_s1] sm:$0xf] (!%p218_p3)  ;;  %vm448_vm0 = vcmask (!%p218_p3), 1043456   ;;  %p272_p4 = scmp.lt.s32.totalorder (!%p218_p3), %s1848_s18, 1  ;;  %vm351_vm1 = vcmask (!%p218_p3), 31744   ;;  %s1858_s9 = smov (!%p218_p3), 120  }
   0x7   : > { %221 = sbr.rel (%p218_p3) target bundleno = 666 (0x29a), region = 32  ;;  %1753 = vmatprep.subr.msk.mxu0 (!%p218_p3), %vm448_vm0, %v343_v0  ;;  %1803 = vmatprep.subr.msk.mxu1 (!%p218_p3), %vm448_vm0, %v343_v0  ;;  %v1992_v33 = vld [vmem:[%s2855_s2] ss:$0 sm:$0xff] (!%p218_p3)  ;;  %s1859_s10 = smov (!%p218_p3), 112  }
   0x8   : > { %1754 = vmatpush3.msk.msra.mxu0 (!%p218_p3), %vm448_vm0, %v343_v0  ;;  %1804 = vmatpush3.msk.msra.mxu1 (!%p218_p3), %vm448_vm0, %v343_v0  ;;  %s1860_s11 = smov (!%p218_p3), 124   ;;  %s1861_s12 = smov (!%p218_p3), 116  }
   0x9   : > { %s1862_s22 = smov (!%p218_p3), 108  }
   0xe   : > { %s2864_s18 = smov (!%p272_p4, %s1848_s18), 1 }
   0xf   : > { %s1716_s24 = sshll.u32 %s2864_s18, 8  ;;  %s1987_s28 = sshll.u32 %s2864_s18, 9 }
  0x10   : > { %s1920_s27 = scalar_lea.vmem %s2853_s0, %s1716_s24  ;;  %s1998_s8 = scalar_lea.vmem %s2856_s3, %s1987_s28 }
  0x11   : > { %v311_v1 = vld [vmem:[%s1920_s27] sm:$0xff]  ;;  %v312_v3 = vld [vmem:[%s1920_s27 + $0x8] sm:$0xff]  ;;  %v313_v5 = vld [vmem:[%s1920_s27 + $0x10] sm:$0xff]  ;;  %s2312_s15 = scalar_lea.vmem %s2857_s4, %s1987_s28  ;;  %s2326_s18 = scalar_lea.vmem %s2858_s5, %s1987_s28 }
  0x12   : > { %v327_v2 = vld [vmem:[%s1920_s27 + $0x80] sm:$0xff]  ;;  %1755 = vmatprep.mubr.msk.f32.mxu0 %vm351_vm1, %v311_v1  ;;  %v328_v4 = vld [vmem:[%s1920_s27 + $0x88] sm:$0xff]  ;;  %v329_v6 = vld [vmem:[%s1920_s27 + $0x90] sm:$0xff] }
  0x13   : > { %1779 = vmatprep.mubr.msk.f32.mxu1 %vm351_vm1, %v327_v2  ;;  %1756 = vmatmul.mubr.msk.f32.vlgmr.msra.gmra.mrb[0].mxu0 %vm351_vm1, %v312_v3  ;;  %v314_v7 = vld [vmem:[%s1920_s27 + $0x18] sm:$0xff]  ;;  %v315_v9 = vld [vmem:[%s1920_s27 + $0x20] sm:$0xff]  ;;  %v316_v11 = vld [vmem:[%s1920_s27 + $0x28] sm:$0xff] }
  0x14   : > { %1780 = vmatmul.mubr.msk.f32.vlgmr.msra.gmra.mrb[0].mxu1 %vm351_vm1, %v328_v4  ;;  %1758 = vmatprep.mubr.msk.f32.mxu0 %vm351_vm1, %v313_v5  ;;  %v330_v8 = vld [vmem:[%s1920_s27 + $0x98] sm:$0xff]  ;;  %v331_v10 = vld [vmem:[%s1920_s27 + $0xa0] sm:$0xff]  ;;  %v332_v12 = vld [vmem:[%s1920_s27 + $0xa8] sm:$0xff] }
  0x15   : > { %1782 = vmatprep.mubr.msk.f32.mxu1 %vm351_vm1, %v329_v6  ;;  %v317_v13 = vld [vmem:[%s1920_s27 + $0x30] sm:$0xff]  ;;  %v318_v15 = vld [vmem:[%s1920_s27 + $0x38] sm:$0xff]  ;;  %v319_v17 = vld [vmem:[%s1920_s27 + $0x40] sm:$0xff] }
  0x16   : > { %v333_v14 = vld [vmem:[%s1920_s27 + $0xb0] sm:$0xff]  ;;  %v334_v16 = vld [vmem:[%s1920_s27 + $0xb8] sm:$0xff]  ;;  %v335_v18 = vld [vmem:[%s1920_s27 + $0xc0] sm:$0xff] }
  0x17   : > { %1759 = vmatmul.mubr.msk.f32.gmra.mrb[2].mxu0 %vm351_vm1, %v314_v7  ;;  %v320_v19 = vld [vmem:[%s1920_s27 + $0x48] sm:$0xff]  ;;  %v321_v21 = vld [vmem:[%s1920_s27 + $0x50] sm:$0xff]  ;;  %v322_v23 = vld [vmem:[%s1920_s27 + $0x58] sm:$0xff] }
  0x18   : > { %1783 = vmatmul.mubr.msk.f32.gmra.mrb[2].mxu1 %vm351_vm1, %v330_v8  ;;  %1761 = vmatprep.mubr.msk.f32.mxu0 %vm351_vm1, %v315_v9  ;;  %v336_v20 = vld [vmem:[%s1920_s27 + $0xc8] sm:$0xff]  ;;  %v337_v22 = vld [vmem:[%s1920_s27 + $0xd0] sm:$0xff]  ;;  %v338_v24 = vld [vmem:[%s1920_s27 + $0xd8] sm:$0xff] }
  0x19   : > { %1785 = vmatprep.mubr.msk.f32.mxu1 %vm351_vm1, %v331_v10  ;;  %v323_v25 = vld [vmem:[%s1920_s27 + $0x60] sm:$0xff]  ;;  %v324_v27 = vld [vmem:[%s1920_s27 + $0x68] sm:$0xff]  ;;  %v325_v29 = vld [vmem:[%s1920_s27 + $0x70] sm:$0xff] }
  0x1a   : > { %v339_v26 = vld [vmem:[%s1920_s27 + $0xe0] sm:$0xff]  ;;  %v340_v28 = vld [vmem:[%s1920_s27 + $0xe8] sm:$0xff]  ;;  %v326_v30 = vld [vmem:[%s1920_s27 + $0x78] sm:$0xff] }
  0x1b   : > { %1762 = vmatmul.mubr.msk.f32.gmra.mrb[4].mxu0 %vm351_vm1, %v316_v11  ;;  %v341_v31 = vld [vmem:[%s1920_s27 + $0xf0] sm:$0xff]  ;;  %v342_v32 = vld [vmem:[%s1920_s27 + $0xf8] sm:$0xff] }
  0x1c   : > { %1786 = vmatmul.mubr.msk.f32.gmra.mrb[4].mxu1 %vm351_vm1, %v332_v12  ;;  %1764 = vmatprep.mubr.msk.f32.mxu0 %vm351_vm1, %v317_v13 }
  0x1d   : > { %1788 = vmatprep.mubr.msk.f32.mxu1 %vm351_vm1, %v333_v14 }
  0x1f   : > { %1765 = vmatmul.mubr.msk.f32.gmra.mrb[6].mxu0 %vm351_vm1, %v318_v15 }
  0x20   : > { %1789 = vmatmul.mubr.msk.f32.gmra.mrb[6].mxu1 %vm351_vm1, %v334_v16  ;;  %1767 = vmatprep.mubr.msk.f32.mxu0 %vm351_vm1, %v319_v17 }
  0x21   : > { %1791 = vmatprep.mubr.msk.f32.mxu1 %vm351_vm1, %v335_v18 }
  0x23   : > { %1768 = vmatmul.mubr.msk.f32.gmra.mrb[8].mxu0 %vm351_vm1, %v320_v19 }
  0x24   : > { %1792 = vmatmul.mubr.msk.f32.gmra.mrb[8].mxu1 %vm351_vm1, %v336_v20  ;;  %1770 = vmatprep.mubr.msk.f32.mxu0 %vm351_vm1, %v321_v21 }
  0x25   : > { %1794 = vmatprep.mubr.msk.f32.mxu1 %vm351_vm1, %v337_v22 }
  0x27   : > { %1771 = vmatmul.mubr.msk.f32.gmra.mrb[10].mxu0 %vm351_vm1, %v322_v23 }
  0x28   : > { %1795 = vmatmul.mubr.msk.f32.gmra.mrb[10].mxu1 %vm351_vm1, %v338_v24  ;;  %1773 = vmatprep.mubr.msk.f32.mxu0 %vm351_vm1, %v323_v25 }
  0x29   : > { %1797 = vmatprep.mubr.msk.f32.mxu1 %vm351_vm1, %v339_v26 }
  0x2b   : > { %1774 = vmatmul.mubr.msk.f32.gmra.mrb[12].mxu0 %vm351_vm1, %v324_v27 }
  0x2c   : > { %1798 = vmatmul.mubr.msk.f32.gmra.mrb[12].mxu1 %vm351_vm1, %v340_v28  ;;  %1776 = vmatprep.mubr.msk.f32.mxu0 %vm351_vm1, %v325_v29 }
  0x2d   : > { %1800 = vmatprep.mubr.msk.f32.mxu1 %vm351_vm1, %v341_v31 }
  0x2f   : > { %1777 = vmatmul.mubr.msk.f32.gmra.mrb[14].mxu0 %vm351_vm1, %v326_v30 }
  0x30   : > { %1801 = vmatmul.mubr.msk.f32.gmra.mrb[14].mxu1 %vm351_vm1, %v342_v32 }
  0xe6   : > { %v1757_v34 = vpop.f32.mrb[0].mxu0 }
  0xe7   : > { %v1781_v35 = vpop.f32.mrb[0].mxu1  ;;  %v2001_v36 = vadd.f32 %v1757_v34, %v1992_v33  ;;  %v518_v38 = vpop.f32.mrb[1].mxu0 }
  0xe8   : > { %v2004_v37 = vadd.f32 %v1781_v35, %v1992_v33  ;;  %v598_v39 = vpop.f32.mrb[1].mxu1  ;;  %v2007_v40 = vadd.f32 %v1992_v33, %v518_v38 }
  0xe9   : > { %v2010_v41 = vadd.f32 %v1992_v33, %v598_v39  ;;  %678 = vst.msk [vmem:[%s1998_s8 + $0x8] sm:$0xff] %vm351_vm1, %v2001_v36  ;;  %743 = vrot.lane.b32.xlu0 %v2001_v36, %s1858_s9 }
  0xea   : > { %694 = vst.msk [vmem:[%s1998_s8 + $0x88] sm:$0xff] %vm351_vm1, %v2004_v37  ;;  %775 = vrot.lane.b32.xlu1 %v2004_v37, %s1858_s9  ;;  %677 = vst.msk [vmem:[%s1998_s8] sm:$0xff] %vm351_vm1, %v2007_v40  ;;  %v1760_v42 = vpop.f32.mrb[2].mxu0 }
  0xeb   : > { %693 = vst.msk [vmem:[%s1998_s8 + $0x80] sm:$0xff] %vm351_vm1, %v2010_v41  ;;  %v1784_v43 = vpop.f32.mrb[2].mxu1  ;;  %v2029_v44 = vadd.f32 %v1760_v42, %v1992_v33  ;;  %v528_v45 = vpop.f32.mrb[3].mxu0 }
  0xec   : > { %v2032_v46 = vadd.f32 %v1784_v43, %v1992_v33  ;;  %v608_v47 = vpop.f32.mrb[3].mxu1  ;;  %v2035_v48 = vadd.f32 %v1992_v33, %v528_v45 }
  0xed   : > { %v2038_v49 = vadd.f32 %v1992_v33, %v608_v47  ;;  %741 = vrot.lane.b32.xlu0 %v2007_v40, %s1858_s9  ;;  %680 = vst.msk [vmem:[%s1998_s8 + $0x18] sm:$0xff] %vm351_vm1, %v2029_v44 }
  0xee   : > { %871 = vrot.lane.b32.xlu1 %v2001_v36, %s1859_s10  ;;  %696 = vst.msk [vmem:[%s1998_s8 + $0x98] sm:$0xff] %vm351_vm1, %v2032_v46  ;;  %679 = vst.msk [vmem:[%s1998_s8 + $0x10] sm:$0xff] %vm351_vm1, %v2035_v48  ;;  %v1763_v50 = vpop.f32.mrb[4].mxu0 }
  0xef   : > { %695 = vst.msk [vmem:[%s1998_s8 + $0x90] sm:$0xff] %vm351_vm1, %v2038_v49  ;;  %v1787_v51 = vpop.f32.mrb[4].mxu1  ;;  %v2057_v52 = vadd.f32 %v1763_v50, %v1992_v33  ;;  %v538_v53 = vpop.f32.mrb[5].mxu0 }
  0xf0   : > { %v2060_v54 = vadd.f32 %v1787_v51, %v1992_v33  ;;  %v618_v55 = vpop.f32.mrb[5].mxu1  ;;  %v2063_v56 = vadd.f32 %v1992_v33, %v538_v53 }
  0xf1   : > { %v2066_v57 = vadd.f32 %v1992_v33, %v618_v55  ;;  %773 = vrot.lane.b32.xlu0 %v2010_v41, %s1858_s9  ;;  %682 = vst.msk [vmem:[%s1998_s8 + $0x28] sm:$0xff] %vm351_vm1, %v2057_v52 }
  0xf2   : > { %903 = vrot.lane.b32.xlu1 %v2004_v37, %s1859_s10  ;;  %698 = vst.msk [vmem:[%s1998_s8 + $0xa8] sm:$0xff] %vm351_vm1, %v2060_v54  ;;  %681 = vst.msk [vmem:[%s1998_s8 + $0x20] sm:$0xff] %vm351_vm1, %v2063_v56  ;;  %v1766_v58 = vpop.f32.mrb[6].mxu0 }
  0xf3   : > { %697 = vst.msk [vmem:[%s1998_s8 + $0xa0] sm:$0xff] %vm351_vm1, %v2066_v57  ;;  %v1790_v59 = vpop.f32.mrb[6].mxu1  ;;  %v2085_v60 = vadd.f32 %v1766_v58, %v1992_v33  ;;  %v548_v61 = vpop.f32.mrb[7].mxu0 }
  0xf4   : > { %v2088_v62 = vadd.f32 %v1790_v59, %v1992_v33  ;;  %v628_v63 = vpop.f32.mrb[7].mxu1  ;;  %v2091_v0 = vadd.f32 %v1992_v33, %v548_v61 }
  0xf5   : > { %v2094_v1 = vadd.f32 %v1992_v33, %v628_v63  ;;  %869 = vrot.lane.b32.xlu0 %v2007_v40, %s1859_s10  ;;  %684 = vst.msk [vmem:[%s1998_s8 + $0x38] sm:$0xff] %vm351_vm1, %v2085_v60 }
  0xf6   : > { %999 = vrot.lane.b32.xlu1 %v2001_v36, %s1860_s11  ;;  %700 = vst.msk [vmem:[%s1998_s8 + $0xb8] sm:$0xff] %vm351_vm1, %v2088_v62  ;;  %683 = vst.msk [vmem:[%s1998_s8 + $0x30] sm:$0xff] %vm351_vm1, %v2091_v0  ;;  %v1769_v2 = vpop.f32.mrb[8].mxu0 }
  0xf7   : > { %699 = vst.msk [vmem:[%s1998_s8 + $0xb0] sm:$0xff] %vm351_vm1, %v2094_v1  ;;  %v1793_v3 = vpop.f32.mrb[8].mxu1  ;;  %v2113_v4 = vadd.f32 %v1769_v2, %v1992_v33  ;;  %v558_v5 = vpop.f32.mrb[9].mxu0 }
  0xf8   : > { %v2116_v6 = vadd.f32 %v1793_v3, %v1992_v33  ;;  %v638_v7 = vpop.f32.mrb[9].mxu1  ;;  %v2119_v8 = vadd.f32 %v1992_v33, %v558_v5 }
  0xf9   : > { %v2122_v9 = vadd.f32 %v1992_v33, %v638_v7  ;;  %901 = vrot.lane.b32.xlu0 %v2010_v41, %s1859_s10  ;;  %686 = vst.msk [vmem:[%s1998_s8 + $0x48] sm:$0xff] %vm351_vm1, %v2113_v4 }
  0xfa   : > { %1031 = vrot.lane.b32.xlu1 %v2004_v37, %s1860_s11  ;;  %702 = vst.msk [vmem:[%s1998_s8 + $0xc8] sm:$0xff] %vm351_vm1, %v2116_v6  ;;  %685 = vst.msk [vmem:[%s1998_s8 + $0x40] sm:$0xff] %vm351_vm1, %v2119_v8  ;;  %v1772_v10 = vpop.f32.mrb[10].mxu0 }
  0xfb   : > { %701 = vst.msk [vmem:[%s1998_s8 + $0xc0] sm:$0xff] %vm351_vm1, %v2122_v9  ;;  %v2153_v11 = vadd.f32 %v1772_v10, %v1992_v33  ;;  %v568_v12 = vpop.f32.mrb[11].mxu0  ;;  %v1796_v14 = vpop.f32.mrb[10].mxu1 }
  0xfc   : > { %v2156_v13 = vadd.f32 %v1992_v33, %v568_v12  ;;  %v2169_v15 = vadd.f32 %v1796_v14, %v1992_v33  ;;  %v648_v16 = vpop.f32.mrb[11].mxu1 }
  0xfd   : > { %997 = vrot.lane.b32.xlu0 %v2007_v40, %s1860_s11  ;;  %688 = vst.msk [vmem:[%s1998_s8 + $0x58] sm:$0xff] %vm351_vm1, %v2153_v11  ;;  %v2172_v17 = vadd.f32 %v1992_v33, %v648_v16 }
  0xfe   : > { %1128 = vrot.lane.b32.xlu1 %v2001_v36, %s1861_s12  ;;  %687 = vst.msk [vmem:[%s1998_s8 + $0x50] sm:$0xff] %vm351_vm1, %v2156_v13  ;;  %704 = vst.msk [vmem:[%s1998_s8 + $0xd8] sm:$0xff] %vm351_vm1, %v2169_v15  ;;  %v1775_v18 = vpop.f32.mrb[12].mxu0 }
  0xff   : > { %703 = vst.msk [vmem:[%s1998_s8 + $0xd0] sm:$0xff] %vm351_vm1, %v2172_v17  ;;  %v2209_v19 = vadd.f32 %v1775_v18, %v1992_v33  ;;  %v578_v20 = vpop.f32.mrb[13].mxu0  ;;  %v1799_v22 = vpop.f32.mrb[12].mxu1 }
 0x100   : > { %v2212_v21 = vadd.f32 %v1992_v33, %v578_v20  ;;  %v2225_v23 = vadd.f32 %v1799_v22, %v1992_v33  ;;  %v658_v24 = vpop.f32.mrb[13].mxu1 }
 0x101   : > { %1029 = vrot.lane.b32.xlu0 %v2010_v41, %s1860_s11  ;;  %690 = vst.msk [vmem:[%s1998_s8 + $0x68] sm:$0xff] %vm351_vm1, %v2209_v19  ;;  %v2228_v25 = vadd.f32 %v1992_v33, %v658_v24 }
 0x102   : > { %1160 = vrot.lane.b32.xlu1 %v2004_v37, %s1861_s12  ;;  %689 = vst.msk [vmem:[%s1998_s8 + $0x60] sm:$0xff] %vm351_vm1, %v2212_v21  ;;  %706 = vst.msk [vmem:[%s1998_s8 + $0xe8] sm:$0xff] %vm351_vm1, %v2225_v23  ;;  %v1778_v26 = vpop.f32.mrb[14].mxu0 }
 0x103   : > { %705 = vst.msk [vmem:[%s1998_s8 + $0xe0] sm:$0xff] %vm351_vm1, %v2228_v25  ;;  %v2265_v27 = vadd.f32 %v1778_v26, %v1992_v33  ;;  %v588_v28 = vpop.f32.mrb[15].mxu0  ;;  %v1802_v30 = vpop.f32.mrb[14].mxu1 }
 0x104   : > { %v2268_v29 = vadd.f32 %v1992_v33, %v588_v28  ;;  %v2281_v31 = vadd.f32 %v1802_v30, %v1992_v33  ;;  %v668_v32 = vpop.f32.mrb[15].mxu1 }
 0x105   : > { %1126 = vrot.lane.b32.xlu0 %v2007_v40, %s1861_s12  ;;  %692 = vst.msk [vmem:[%s1998_s8 + $0x78] sm:$0xff] %vm351_vm1, %v2265_v27  ;;  %v2284_v34 = vadd.f32 %v1992_v33, %v668_v32 }
 0x106   : > { %747 = vrot.lane.b32.xlu1 %v2029_v44, %s1858_s9  ;;  %691 = vst.msk [vmem:[%s1998_s8 + $0x70] sm:$0xff] %vm351_vm1, %v2268_v29  ;;  %708 = vst.msk [vmem:[%s1998_s8 + $0xf8] sm:$0xff] %vm351_vm1, %v2281_v31 }
 0x107   : > { %707 = vst.msk [vmem:[%s1998_s8 + $0xf0] sm:$0xff] %vm351_vm1, %v2284_v34 }
 0x109   : > { %1158 = vrot.lane.b32.xlu0 %v2010_v41, %s1861_s12 }
 0x10a   : > { %779 = vrot.lane.b32.xlu1 %v2032_v46, %s1858_s9 }
 0x10d   : > { %777 = vrot.lane.b32.xlu0 %v2038_v49, %s1858_s9 }
 0x10e   : > { %875 = vrot.lane.b32.xlu1 %v2029_v44, %s1859_s10 }
 0x111   : > { %873 = vrot.lane.b32.xlu0 %v2035_v48, %s1859_s10 }
 0x112   : > { %907 = vrot.lane.b32.xlu1 %v2032_v46, %s1859_s10 }
 0x115   : > { %905 = vrot.lane.b32.xlu0 %v2038_v49, %s1859_s10 }
 0x116   : > { %1003 = vrot.lane.b32.xlu1 %v2029_v44, %s1860_s11 }
 0x119   : > { %1001 = vrot.lane.b32.xlu0 %v2035_v48, %s1860_s11 }
 0x11a   : > { %1035 = vrot.lane.b32.xlu1 %v2032_v46, %s1860_s11 }
 0x11d   : > { %1033 = vrot.lane.b32.xlu0 %v2038_v49, %s1860_s11 }
 0x11e   : > { %1132 = vrot.lane.b32.xlu1 %v2029_v44, %s1861_s12 }
 0x121   : > { %1130 = vrot.lane.b32.xlu0 %v2035_v48, %s1861_s12 }
 0x122   : > { %1164 = vrot.lane.b32.xlu1 %v2032_v46, %s1861_s12 }
 0x125   : > { %1162 = vrot.lane.b32.xlu0 %v2038_v49, %s1861_s12 }
 0x126   : > { %745 = vrot.lane.b32.xlu1 %v2035_v48, %s1858_s9 }
 0x129   : > { %749 = vrot.lane.b32.xlu0 %v2063_v56, %s1858_s9 }
 0x12a   : > { %751 = vrot.lane.b32.xlu1 %v2057_v52, %s1858_s9 }
 0x12d   : > { %781 = vrot.lane.b32.xlu0 %v2066_v57, %s1858_s9 }
 0x12e   : > { %783 = vrot.lane.b32.xlu1 %v2060_v54, %s1858_s9 }
 0x131   : > { %877 = vrot.lane.b32.xlu0 %v2063_v56, %s1859_s10 }
 0x132   : > { %879 = vrot.lane.b32.xlu1 %v2057_v52, %s1859_s10 }
 0x135   : > { %909 = vrot.lane.b32.xlu0 %v2066_v57, %s1859_s10 }
 0x136   : > { %911 = vrot.lane.b32.xlu1 %v2060_v54, %s1859_s10 }
 0x139   : > { %1005 = vrot.lane.b32.xlu0 %v2063_v56, %s1860_s11 }
 0x13a   : > { %1007 = vrot.lane.b32.xlu1 %v2057_v52, %s1860_s11 }
 0x13d   : > { %1037 = vrot.lane.b32.xlu0 %v2066_v57, %s1860_s11 }
 0x13e   : > { %1039 = vrot.lane.b32.xlu1 %v2060_v54, %s1860_s11 }
 0x141   : > { %1134 = vrot.lane.b32.xlu0 %v2063_v56, %s1861_s12 }
 0x142   : > { %1136 = vrot.lane.b32.xlu1 %v2057_v52, %s1861_s12 }
 0x145   : > { %1166 = vrot.lane.b32.xlu0 %v2066_v57, %s1861_s12 }
 0x146   : > { %1168 = vrot.lane.b32.xlu1 %v2060_v54, %s1861_s12 }
 0x149   : > { %753 = vrot.lane.b32.xlu0 %v2091_v0, %s1858_s9 }
 0x14a   : > { %755 = vrot.lane.b32.xlu1 %v2085_v60, %s1858_s9 }
 0x14d   : > { %785 = vrot.lane.b32.xlu0 %v2094_v1, %s1858_s9 }
 0x14e   : > { %787 = vrot.lane.b32.xlu1 %v2088_v62, %s1858_s9 }
 0x151   : > { %881 = vrot.lane.b32.xlu0 %v2091_v0, %s1859_s10 }
 0x152   : > { %883 = vrot.lane.b32.xlu1 %v2085_v60, %s1859_s10 }
 0x155   : > { %913 = vrot.lane.b32.xlu0 %v2094_v1, %s1859_s10 }
 0x156   : > { %915 = vrot.lane.b32.xlu1 %v2088_v62, %s1859_s10 }
 0x159   : > { %1009 = vrot.lane.b32.xlu0 %v2091_v0, %s1860_s11 }
 0x15a   : > { %1011 = vrot.lane.b32.xlu1 %v2085_v60, %s1860_s11 }
 0x15b   : > { %v744_v35 = vpop.permute.xlu0 %743 }
 0x15c   : > { %v776_v33 = vpop.permute.xlu1 %775  ;;  %838 = vst.msk [vmem:[%s2312_s15 + $0x8] sm:$0xff] %vm351_vm1, %v744_v35 }
 0x15d   : > { %854 = vst.msk [vmem:[%s2312_s15 + $0x88] sm:$0xff] %vm351_vm1, %v776_v33  ;;  %1041 = vrot.lane.b32.xlu0 %v2094_v1, %s1860_s11 }
 0x15e   : > { %1043 = vrot.lane.b32.xlu1 %v2088_v62, %s1860_s11 }
 0x15f   : > { %v742_v39 = vpop.permute.xlu0 %741 }
 0x160   : > { %v872_v38 = vpop.permute.xlu1 %871  ;;  %837 = vst.msk [vmem:[%s2312_s15] sm:$0xff] %vm351_vm1, %v742_v39 }
 0x161   : > { %966 = vst.msk [vmem:[%s2326_s18 + $0x8] sm:$0xff] %vm351_vm1, %v872_v38  ;;  %1138 = vrot.lane.b32.xlu0 %v2091_v0, %s1861_s12 }
 0x162   : > { %1140 = vrot.lane.b32.xlu1 %v2085_v60, %s1861_s12 }
 0x163   : > { %v774_v43 = vpop.permute.xlu0 %773 }
 0x164   : > { %v904_v42 = vpop.permute.xlu1 %903  ;;  %853 = vst.msk [vmem:[%s2312_s15 + $0x80] sm:$0xff] %vm351_vm1, %v774_v43 }
 0x165   : > { %982 = vst.msk [vmem:[%s2326_s18 + $0x88] sm:$0xff] %vm351_vm1, %v904_v42  ;;  %1170 = vrot.lane.b32.xlu0 %v2094_v1, %s1861_s12 }
 0x166   : > { %1172 = vrot.lane.b32.xlu1 %v2088_v62, %s1861_s12 }
 0x167   : > { %v870_v47 = vpop.permute.xlu0 %869 }
 0x168   : > { %v1000_v45 = vpop.permute.xlu1 %999  ;;  %965 = vst.msk [vmem:[%s2326_s18] sm:$0xff] %vm351_vm1, %v870_v47 }
 0x169   : > { %1619 = vst.msk [vmem:[%s1998_s8 + $0x108] sm:$0xff] %vm351_vm1, %v1000_v45  ;;  %757 = vrot.lane.b32.xlu0 %v2119_v8, %s1858_s9 }
 0x16a   : > { %759 = vrot.lane.b32.xlu1 %v2113_v4, %s1858_s9 }
 0x16b   : > { %v902_v51 = vpop.permute.xlu0 %901 }
 0x16c   : > { %v1032_v50 = vpop.permute.xlu1 %1031  ;;  %981 = vst.msk [vmem:[%s2326_s18 + $0x80] sm:$0xff] %vm351_vm1, %v902_v51 }
 0x16d   : > { %1635 = vst.msk [vmem:[%s1998_s8 + $0x188] sm:$0xff] %vm351_vm1, %v1032_v50  ;;  %789 = vrot.lane.b32.xlu0 %v2122_v9, %s1858_s9 }
 0x16e   : > { %791 = vrot.lane.b32.xlu1 %v2116_v6, %s1858_s9 }
 0x16f   : > { %v998_v55 = vpop.permute.xlu0 %997 }
 0x170   : > { %v1129_v53 = vpop.permute.xlu1 %1128  ;;  %1618 = vst.msk [vmem:[%s1998_s8 + $0x100] sm:$0xff] %vm351_vm1, %v998_v55 }
 0x171   : > { %1651 = vst.msk [vmem:[%s2312_s15 + $0x108] sm:$0xff] %vm351_vm1, %v1129_v53  ;;  %885 = vrot.lane.b32.xlu0 %v2119_v8, %s1859_s10 }
 0x172   : > { %887 = vrot.lane.b32.xlu1 %v2113_v4, %s1859_s10 }
 0x173   : > { %v1030_v59 = vpop.permute.xlu0 %1029 }
 0x174   : > { %v1161_v58 = vpop.permute.xlu1 %1160  ;;  %1634 = vst.msk [vmem:[%s1998_s8 + $0x180] sm:$0xff] %vm351_vm1, %v1030_v59 }
 0x175   : > { %1667 = vst.msk [vmem:[%s2312_s15 + $0x188] sm:$0xff] %vm351_vm1, %v1161_v58  ;;  %917 = vrot.lane.b32.xlu0 %v2122_v9, %s1859_s10 }
 0x176   : > { %919 = vrot.lane.b32.xlu1 %v2116_v6, %s1859_s10 }
 0x177   : > { %v1127_v63 = vpop.permute.xlu0 %1126 }
 0x178   : > { %v748_v61 = vpop.permute.xlu1 %747  ;;  %1650 = vst.msk [vmem:[%s2312_s15 + $0x100] sm:$0xff] %vm351_vm1, %v1127_v63 }
 0x179   : > { %840 = vst.msk [vmem:[%s2312_s15 + $0x18] sm:$0xff] %vm351_vm1, %v748_v61  ;;  %1013 = vrot.lane.b32.xlu0 %v2119_v8, %s1860_s11 }
 0x17a   : > { %1015 = vrot.lane.b32.xlu1 %v2113_v4, %s1860_s11 }
 0x17b   : > { %v1159_v3 = vpop.permute.xlu0 %1158 }
 0x17c   : > { %v780_v2 = vpop.permute.xlu1 %779  ;;  %1666 = vst.msk [vmem:[%s2312_s15 + $0x180] sm:$0xff] %vm351_vm1, %v1159_v3 }
 0x17d   : > { %856 = vst.msk [vmem:[%s2312_s15 + $0x98] sm:$0xff] %vm351_vm1, %v780_v2  ;;  %1045 = vrot.lane.b32.xlu0 %v2122_v9, %s1860_s11 }
 0x17e   : > { %1047 = vrot.lane.b32.xlu1 %v2116_v6, %s1860_s11 }
 0x17f   : > { %v778_v7 = vpop.permute.xlu0 %777 }
 0x180   : > { %v876_v5 = vpop.permute.xlu1 %875  ;;  %855 = vst.msk [vmem:[%s2312_s15 + $0x90] sm:$0xff] %vm351_vm1, %v778_v7 }
 0x181   : > { %968 = vst.msk [vmem:[%s2326_s18 + $0x18] sm:$0xff] %vm351_vm1, %v876_v5  ;;  %1142 = vrot.lane.b32.xlu0 %v2119_v8, %s1861_s12 }
 0x182   : > { %1144 = vrot.lane.b32.xlu1 %v2113_v4, %s1861_s12 }
 0x183   : > { %v874_v12 = vpop.permute.xlu0 %873 }
 0x184   : > { %v908_v10 = vpop.permute.xlu1 %907  ;;  %967 = vst.msk [vmem:[%s2326_s18 + $0x10] sm:$0xff] %vm351_vm1, %v874_v12 }
 0x185   : > { %984 = vst.msk [vmem:[%s2326_s18 + $0x98] sm:$0xff] %vm351_vm1, %v908_v10  ;;  %1174 = vrot.lane.b32.xlu0 %v2122_v9, %s1861_s12 }
 0x186   : > { %1176 = vrot.lane.b32.xlu1 %v2116_v6, %s1861_s12 }
 0x187   : > { %v906_v16 = vpop.permute.xlu0 %905 }
 0x188   : > { %v1004_v14 = vpop.permute.xlu1 %1003  ;;  %983 = vst.msk [vmem:[%s2326_s18 + $0x90] sm:$0xff] %vm351_vm1, %v906_v16 }
 0x189   : > { %1621 = vst.msk [vmem:[%s1998_s8 + $0x118] sm:$0xff] %vm351_vm1, %v1004_v14  ;;  %761 = vrot.lane.b32.xlu0 %v2156_v13, %s1858_s9 }
 0x18a   : > { %763 = vrot.lane.b32.xlu1 %v2153_v11, %s1858_s9 }
 0x18b   : > { %v1002_v20 = vpop.permute.xlu0 %1001 }
 0x18c   : > { %v1036_v18 = vpop.permute.xlu1 %1035  ;;  %1620 = vst.msk [vmem:[%s1998_s8 + $0x110] sm:$0xff] %vm351_vm1, %v1002_v20 }
 0x18d   : > { %1637 = vst.msk [vmem:[%s1998_s8 + $0x198] sm:$0xff] %vm351_vm1, %v1036_v18  ;;  %793 = vrot.lane.b32.xlu0 %v2172_v17, %s1858_s9 }
 0x18e   : > { %795 = vrot.lane.b32.xlu1 %v2169_v15, %s1858_s9 }
 0x18f   : > { %v1034_v24 = vpop.permute.xlu0 %1033 }
 0x190   : > { %v1133_v22 = vpop.permute.xlu1 %1132  ;;  %1636 = vst.msk [vmem:[%s1998_s8 + $0x190] sm:$0xff] %vm351_vm1, %v1034_v24 }
 0x191   : > { %1653 = vst.msk [vmem:[%s2312_s15 + $0x118] sm:$0xff] %vm351_vm1, %v1133_v22  ;;  %889 = vrot.lane.b32.xlu0 %v2156_v13, %s1859_s10 }
 0x192   : > { %891 = vrot.lane.b32.xlu1 %v2153_v11, %s1859_s10 }
 0x193   : > { %v1131_v28 = vpop.permute.xlu0 %1130 }
 0x194   : > { %v1165_v26 = vpop.permute.xlu1 %1164  ;;  %1652 = vst.msk [vmem:[%s2312_s15 + $0x110] sm:$0xff] %vm351_vm1, %v1131_v28 }
 0x195   : > { %1669 = vst.msk [vmem:[%s2312_s15 + $0x198] sm:$0xff] %vm351_vm1, %v1165_v26  ;;  %921 = vrot.lane.b32.xlu0 %v2172_v17, %s1859_s10 }
 0x196   : > { %923 = vrot.lane.b32.xlu1 %v2169_v15, %s1859_s10 }
 0x197   : > { %v1163_v32 = vpop.permute.xlu0 %1162 }
 0x198   : > { %v746_v30 = vpop.permute.xlu1 %745  ;;  %1668 = vst.msk [vmem:[%s2312_s15 + $0x190] sm:$0xff] %vm351_vm1, %v1163_v32 }
 0x199   : > { %839 = vst.msk [vmem:[%s2312_s15 + $0x10] sm:$0xff] %vm351_vm1, %v746_v30  ;;  %1017 = vrot.lane.b32.xlu0 %v2156_v13, %s1860_s11 }
 0x19a   : > { %1019 = vrot.lane.b32.xlu1 %v2153_v11, %s1860_s11 }
 0x19b   : > { %v750_v35 = vpop.permute.xlu0 %749 }
 0x19c   : > { %v752_v33 = vpop.permute.xlu1 %751  ;;  %841 = vst.msk [vmem:[%s2312_s15 + $0x20] sm:$0xff] %vm351_vm1, %v750_v35 }
 0x19d   : > { %842 = vst.msk [vmem:[%s2312_s15 + $0x28] sm:$0xff] %vm351_vm1, %v752_v33  ;;  %1049 = vrot.lane.b32.xlu0 %v2172_v17, %s1860_s11 }
 0x19e   : > { %1051 = vrot.lane.b32.xlu1 %v2169_v15, %s1860_s11 }
 0x19f   : > { %v782_v39 = vpop.permute.xlu0 %781 }
 0x1a0   : > { %v784_v38 = vpop.permute.xlu1 %783  ;;  %857 = vst.msk [vmem:[%s2312_s15 + $0xa0] sm:$0xff] %vm351_vm1, %v782_v39 }
 0x1a1   : > { %858 = vst.msk [vmem:[%s2312_s15 + $0xa8] sm:$0xff] %vm351_vm1, %v784_v38  ;;  %1146 = vrot.lane.b32.xlu0 %v2156_v13, %s1861_s12 }
 0x1a2   : > { %1148 = vrot.lane.b32.xlu1 %v2153_v11, %s1861_s12 }
 0x1a3   : > { %v878_v43 = vpop.permute.xlu0 %877 }
 0x1a4   : > { %v880_v42 = vpop.permute.xlu1 %879  ;;  %969 = vst.msk [vmem:[%s2326_s18 + $0x20] sm:$0xff] %vm351_vm1, %v878_v43 }
 0x1a5   : > { %970 = vst.msk [vmem:[%s2326_s18 + $0x28] sm:$0xff] %vm351_vm1, %v880_v42  ;;  %1178 = vrot.lane.b32.xlu0 %v2172_v17, %s1861_s12 }
 0x1a6   : > { %1180 = vrot.lane.b32.xlu1 %v2169_v15, %s1861_s12 }
 0x1a7   : > { %v910_v47 = vpop.permute.xlu0 %909 }
 0x1a8   : > { %v912_v45 = vpop.permute.xlu1 %911  ;;  %985 = vst.msk [vmem:[%s2326_s18 + $0xa0] sm:$0xff] %vm351_vm1, %v910_v47 }
 0x1a9   : > { %986 = vst.msk [vmem:[%s2326_s18 + $0xa8] sm:$0xff] %vm351_vm1, %v912_v45  ;;  %765 = vrot.lane.b32.xlu0 %v2212_v21, %s1858_s9 }
 0x1aa   : > { %767 = vrot.lane.b32.xlu1 %v2209_v19, %s1858_s9 }
 0x1ab   : > { %v1006_v51 = vpop.permute.xlu0 %1005 }
 0x1ac   : > { %v1008_v50 = vpop.permute.xlu1 %1007  ;;  %1622 = vst.msk [vmem:[%s1998_s8 + $0x120] sm:$0xff] %vm351_vm1, %v1006_v51 }
 0x1ad   : > { %1623 = vst.msk [vmem:[%s1998_s8 + $0x128] sm:$0xff] %vm351_vm1, %v1008_v50  ;;  %797 = vrot.lane.b32.xlu0 %v2228_v25, %s1858_s9 }
 0x1ae   : > { %799 = vrot.lane.b32.xlu1 %v2225_v23, %s1858_s9 }
 0x1af   : > { %v1038_v55 = vpop.permute.xlu0 %1037 }
 0x1b0   : > { %v1040_v53 = vpop.permute.xlu1 %1039  ;;  %1638 = vst.msk [vmem:[%s1998_s8 + $0x1a0] sm:$0xff] %vm351_vm1, %v1038_v55 }
 0x1b1   : > { %1639 = vst.msk [vmem:[%s1998_s8 + $0x1a8] sm:$0xff] %vm351_vm1, %v1040_v53  ;;  %893 = vrot.lane.b32.xlu0 %v2212_v21, %s1859_s10 }
 0x1b2   : > { %895 = vrot.lane.b32.xlu1 %v2209_v19, %s1859_s10 }
 0x1b3   : > { %v1135_v59 = vpop.permute.xlu0 %1134 }
 0x1b4   : > { %v1137_v58 = vpop.permute.xlu1 %1136  ;;  %1654 = vst.msk [vmem:[%s2312_s15 + $0x120] sm:$0xff] %vm351_vm1, %v1135_v59 }
 0x1b5   : > { %1655 = vst.msk [vmem:[%s2312_s15 + $0x128] sm:$0xff] %vm351_vm1, %v1137_v58  ;;  %925 = vrot.lane.b32.xlu0 %v2228_v25, %s1859_s10 }
 0x1b6   : > { %927 = vrot.lane.b32.xlu1 %v2225_v23, %s1859_s10 }
 0x1b7   : > { %v1167_v63 = vpop.permute.xlu0 %1166 }
 0x1b8   : > { %v1169_v61 = vpop.permute.xlu1 %1168  ;;  %1670 = vst.msk [vmem:[%s2312_s15 + $0x1a0] sm:$0xff] %vm351_vm1, %v1167_v63 }
 0x1b9   : > { %1671 = vst.msk [vmem:[%s2312_s15 + $0x1a8] sm:$0xff] %vm351_vm1, %v1169_v61  ;;  %1021 = vrot.lane.b32.xlu0 %v2212_v21, %s1860_s11 }
 0x1ba   : > { %1023 = vrot.lane.b32.xlu1 %v2209_v19, %s1860_s11 }
 0x1bb   : > { %v754_v3 = vpop.permute.xlu0 %753 }
 0x1bc   : > { %v756_v2 = vpop.permute.xlu1 %755  ;;  %843 = vst.msk [vmem:[%s2312_s15 + $0x30] sm:$0xff] %vm351_vm1, %v754_v3 }
 0x1bd   : > { %844 = vst.msk [vmem:[%s2312_s15 + $0x38] sm:$0xff] %vm351_vm1, %v756_v2  ;;  %1053 = vrot.lane.b32.xlu0 %v2228_v25, %s1860_s11 }
 0x1be   : > { %1055 = vrot.lane.b32.xlu1 %v2225_v23, %s1860_s11 }
 0x1bf   : > { %v786_v7 = vpop.permute.xlu0 %785 }
 0x1c0   : > { %v788_v5 = vpop.permute.xlu1 %787  ;;  %859 = vst.msk [vmem:[%s2312_s15 + $0xb0] sm:$0xff] %vm351_vm1, %v786_v7 }
 0x1c1   : > { %860 = vst.msk [vmem:[%s2312_s15 + $0xb8] sm:$0xff] %vm351_vm1, %v788_v5  ;;  %1150 = vrot.lane.b32.xlu0 %v2212_v21, %s1861_s12 }
 0x1c2   : > { %1152 = vrot.lane.b32.xlu1 %v2209_v19, %s1861_s12 }
 0x1c3   : > { %v882_v12 = vpop.permute.xlu0 %881 }
 0x1c4   : > { %v884_v10 = vpop.permute.xlu1 %883  ;;  %971 = vst.msk [vmem:[%s2326_s18 + $0x30] sm:$0xff] %vm351_vm1, %v882_v12 }
 0x1c5   : > { %972 = vst.msk [vmem:[%s2326_s18 + $0x38] sm:$0xff] %vm351_vm1, %v884_v10  ;;  %1182 = vrot.lane.b32.xlu0 %v2228_v25, %s1861_s12 }
 0x1c6   : > { %1184 = vrot.lane.b32.xlu1 %v2225_v23, %s1861_s12 }
 0x1c7   : > { %v914_v16 = vpop.permute.xlu0 %913 }
 0x1c8   : > { %v916_v14 = vpop.permute.xlu1 %915  ;;  %987 = vst.msk [vmem:[%s2326_s18 + $0xb0] sm:$0xff] %vm351_vm1, %v914_v16 }
 0x1c9   : > { %988 = vst.msk [vmem:[%s2326_s18 + $0xb8] sm:$0xff] %vm351_vm1, %v916_v14  ;;  %769 = vrot.lane.b32.xlu0 %v2268_v29, %s1858_s9 }
 0x1ca   : > { %771 = vrot.lane.b32.xlu1 %v2265_v27, %s1858_s9 }
 0x1cb   : > { %v1010_v20 = vpop.permute.xlu0 %1009 }
 0x1cc   : > { %v1012_v18 = vpop.permute.xlu1 %1011  ;;  %1624 = vst.msk [vmem:[%s1998_s8 + $0x130] sm:$0xff] %vm351_vm1, %v1010_v20 }
 0x1cd   : > { %1625 = vst.msk [vmem:[%s1998_s8 + $0x138] sm:$0xff] %vm351_vm1, %v1012_v18  ;;  %801 = vrot.lane.b32.xlu0 %v2284_v34, %s1858_s9 }
 0x1ce   : > { %803 = vrot.lane.b32.xlu1 %v2281_v31, %s1858_s9 }
 0x1cf   : > { %v1042_v24 = vpop.permute.xlu0 %1041 }
 0x1d0   : > { %v1044_v22 = vpop.permute.xlu1 %1043  ;;  %1640 = vst.msk [vmem:[%s1998_s8 + $0x1b0] sm:$0xff] %vm351_vm1, %v1042_v24 }
 0x1d1   : > { %1641 = vst.msk [vmem:[%s1998_s8 + $0x1b8] sm:$0xff] %vm351_vm1, %v1044_v22  ;;  %897 = vrot.lane.b32.xlu0 %v2268_v29, %s1859_s10 }
 0x1d2   : > { %899 = vrot.lane.b32.xlu1 %v2265_v27, %s1859_s10 }
 0x1d3   : > { %v1139_v28 = vpop.permute.xlu0 %1138 }
 0x1d4   : > { %v1141_v26 = vpop.permute.xlu1 %1140  ;;  %1656 = vst.msk [vmem:[%s2312_s15 + $0x130] sm:$0xff] %vm351_vm1, %v1139_v28 }
 0x1d5   : > { %1657 = vst.msk [vmem:[%s2312_s15 + $0x138] sm:$0xff] %vm351_vm1, %v1141_v26  ;;  %929 = vrot.lane.b32.xlu0 %v2284_v34, %s1859_s10 }
 0x1d6   : > { %931 = vrot.lane.b32.xlu1 %v2281_v31, %s1859_s10 }
 0x1d7   : > { %v1171_v32 = vpop.permute.xlu0 %1170 }
 0x1d8   : > { %v1173_v30 = vpop.permute.xlu1 %1172  ;;  %1672 = vst.msk [vmem:[%s2312_s15 + $0x1b0] sm:$0xff] %vm351_vm1, %v1171_v32 }
 0x1d9   : > { %1673 = vst.msk [vmem:[%s2312_s15 + $0x1b8] sm:$0xff] %vm351_vm1, %v1173_v30  ;;  %1025 = vrot.lane.b32.xlu0 %v2268_v29, %s1860_s11 }
 0x1da   : > { %1027 = vrot.lane.b32.xlu1 %v2265_v27, %s1860_s11 }
 0x1db   : > { %v758_v35 = vpop.permute.xlu0 %757 }
 0x1dc   : > { %v760_v33 = vpop.permute.xlu1 %759  ;;  %845 = vst.msk [vmem:[%s2312_s15 + $0x40] sm:$0xff] %vm351_vm1, %v758_v35 }
 0x1dd   : > { %846 = vst.msk [vmem:[%s2312_s15 + $0x48] sm:$0xff] %vm351_vm1, %v760_v33  ;;  %1057 = vrot.lane.b32.xlu0 %v2284_v34, %s1860_s11 }
 0x1de   : > { %1059 = vrot.lane.b32.xlu1 %v2281_v31, %s1860_s11 }
 0x1df   : > { %v790_v39 = vpop.permute.xlu0 %789 }
 0x1e0   : > { %v792_v38 = vpop.permute.xlu1 %791  ;;  %861 = vst.msk [vmem:[%s2312_s15 + $0xc0] sm:$0xff] %vm351_vm1, %v790_v39 }
 0x1e1   : > { %862 = vst.msk [vmem:[%s2312_s15 + $0xc8] sm:$0xff] %vm351_vm1, %v792_v38  ;;  %1154 = vrot.lane.b32.xlu0 %v2268_v29, %s1861_s12 }
 0x1e2   : > { %1156 = vrot.lane.b32.xlu1 %v2265_v27, %s1861_s12 }
 0x1e3   : > { %v886_v43 = vpop.permute.xlu0 %885 }
 0x1e4   : > { %v888_v42 = vpop.permute.xlu1 %887  ;;  %973 = vst.msk [vmem:[%s2326_s18 + $0x40] sm:$0xff] %vm351_vm1, %v886_v43 }
 0x1e5   : > { %974 = vst.msk [vmem:[%s2326_s18 + $0x48] sm:$0xff] %vm351_vm1, %v888_v42  ;;  %1186 = vrot.lane.b32.xlu0 %v2284_v34, %s1861_s12 }
 0x1e6   : > { %1188 = vrot.lane.b32.xlu1 %v2281_v31, %s1861_s12 }
 0x1e7   : > { %v918_v47 = vpop.permute.xlu0 %917 }
 0x1e8   : > { %v920_v45 = vpop.permute.xlu1 %919  ;;  %989 = vst.msk [vmem:[%s2326_s18 + $0xc0] sm:$0xff] %vm351_vm1, %v918_v47 }
 0x1e9   : > { %990 = vst.msk [vmem:[%s2326_s18 + $0xc8] sm:$0xff] %vm351_vm1, %v920_v45  ;;  %1255 = vrot.lane.b32.xlu0 %v2007_v40, %s1862_s22 }
 0x1ea   : > { %1257 = vrot.lane.b32.xlu1 %v2001_v36, %s1862_s22 }
 0x1eb   : > { %v1014_v51 = vpop.permute.xlu0 %1013 }
 0x1ec   : > { %v1016_v50 = vpop.permute.xlu1 %1015  ;;  %1626 = vst.msk [vmem:[%s1998_s8 + $0x140] sm:$0xff] %vm351_vm1, %v1014_v51 }
 0x1ed   : > { %1627 = vst.msk [vmem:[%s1998_s8 + $0x148] sm:$0xff] %vm351_vm1, %v1016_v50  ;;  %1259 = vrot.lane.b32.xlu0 %v2035_v48, %s1862_s22 }
 0x1ee   : > { %1261 = vrot.lane.b32.xlu1 %v2029_v44, %s1862_s22 }
 0x1ef   : > { %v1046_v53 = vpop.permute.xlu0 %1045 }
 0x1f0   : > { %v1048_v36 = vpop.permute.xlu1 %1047  ;;  %1642 = vst.msk [vmem:[%s1998_s8 + $0x1c0] sm:$0xff] %vm351_vm1, %v1046_v53 }
 0x1f1   : > { %1643 = vst.msk [vmem:[%s1998_s8 + $0x1c8] sm:$0xff] %vm351_vm1, %v1048_v36  ;;  %1263 = vrot.lane.b32.xlu0 %v2063_v56, %s1862_s22 }
 0x1f2   : > { %1265 = vrot.lane.b32.xlu1 %v2057_v52, %s1862_s22 }
 0x1f3   : > { %v1143_v44 = vpop.permute.xlu0 %1142 }
 0x1f4   : > { %v1145_v40 = vpop.permute.xlu1 %1144  ;;  %1658 = vst.msk [vmem:[%s2312_s15 + $0x140] sm:$0xff] %vm351_vm1, %v1143_v44 }
 0x1f5   : > { %1659 = vst.msk [vmem:[%s2312_s15 + $0x148] sm:$0xff] %vm351_vm1, %v1145_v40  ;;  %1267 = vrot.lane.b32.xlu0 %v2091_v0, %s1862_s22 }
 0x1f6   : > { %1269 = vrot.lane.b32.xlu1 %v2085_v60, %s1862_s22 }
 0x1f7   : > { %v1175_v52 = vpop.permute.xlu0 %1174 }
 0x1f8   : > { %v1177_v48 = vpop.permute.xlu1 %1176  ;;  %1674 = vst.msk [vmem:[%s2312_s15 + $0x1c0] sm:$0xff] %vm351_vm1, %v1175_v52 }
 0x1f9   : > { %1675 = vst.msk [vmem:[%s2312_s15 + $0x1c8] sm:$0xff] %vm351_vm1, %v1177_v48  ;;  %1271 = vrot.lane.b32.xlu0 %v2119_v8, %s1862_s22 }
 0x1fa   : > { %1273 = vrot.lane.b32.xlu1 %v2113_v4, %s1862_s22 }
 0x1fb   : > { %v762_v60 = vpop.permute.xlu0 %761 }
 0x1fc   : > { %v764_v56 = vpop.permute.xlu1 %763  ;;  %847 = vst.msk [vmem:[%s2312_s15 + $0x50] sm:$0xff] %vm351_vm1, %v762_v60 }
 0x1fd   : > { %848 = vst.msk [vmem:[%s2312_s15 + $0x58] sm:$0xff] %vm351_vm1, %v764_v56  ;;  %1275 = vrot.lane.b32.xlu0 %v2156_v13, %s1862_s22 }
 0x1fe   : > { %1277 = vrot.lane.b32.xlu1 %v2153_v11, %s1862_s22 }
 0x1ff   : > { %v794_v4 = vpop.permute.xlu0 %793 }
 0x200   : > { %v796_v0 = vpop.permute.xlu1 %795  ;;  %863 = vst.msk [vmem:[%s2312_s15 + $0xd0] sm:$0xff] %vm351_vm1, %v794_v4 }
 0x201   : > { %864 = vst.msk [vmem:[%s2312_s15 + $0xd8] sm:$0xff] %vm351_vm1, %v796_v0  ;;  %1279 = vrot.lane.b32.xlu0 %v2212_v21, %s1862_s22 }
 0x202   : > { %1281 = vrot.lane.b32.xlu1 %v2209_v19, %s1862_s22 }
 0x203   : > { %v890_v11 = vpop.permute.xlu0 %889 }
 0x204   : > { %v892_v8 = vpop.permute.xlu1 %891  ;;  %975 = vst.msk [vmem:[%s2326_s18 + $0x50] sm:$0xff] %vm351_vm1, %v890_v11 }
 0x205   : > { %976 = vst.msk [vmem:[%s2326_s18 + $0x58] sm:$0xff] %vm351_vm1, %v892_v8  ;;  %1283 = vrot.lane.b32.xlu0 %v2268_v29, %s1862_s22 }
 0x206   : > { %1285 = vrot.lane.b32.xlu1 %v2265_v27, %s1862_s22 }
 0x207   : > { %v922_v19 = vpop.permute.xlu0 %921 }
 0x208   : > { %v924_v13 = vpop.permute.xlu1 %923  ;;  %991 = vst.msk [vmem:[%s2326_s18 + $0xd0] sm:$0xff] %vm351_vm1, %v922_v19 }
 0x209   : > { %992 = vst.msk [vmem:[%s2326_s18 + $0xd8] sm:$0xff] %vm351_vm1, %v924_v13  ;;  %1287 = vrot.lane.b32.xlu0 %v2010_v41, %s1862_s22 }
 0x20a   : > { %1289 = vrot.lane.b32.xlu1 %v2004_v37, %s1862_s22 }
 0x20b   : > { %v1018_v27 = vpop.permute.xlu0 %1017 }
 0x20c   : > { %v1020_v21 = vpop.permute.xlu1 %1019  ;;  %1628 = vst.msk [vmem:[%s1998_s8 + $0x150] sm:$0xff] %vm351_vm1, %v1018_v27 }
 0x20d   : > { %1629 = vst.msk [vmem:[%s1998_s8 + $0x158] sm:$0xff] %vm351_vm1, %v1020_v21  ;;  %1291 = vrot.lane.b32.xlu0 %v2038_v49, %s1862_s22 }
 0x20e   : > { %1293 = vrot.lane.b32.xlu1 %v2032_v46, %s1862_s22 }
 0x20f   : > { %v1050_v29 = vpop.permute.xlu0 %1049 }
 0x210   : > { %v1052_v37 = vpop.permute.xlu1 %1051  ;;  %1644 = vst.msk [vmem:[%s1998_s8 + $0x1d0] sm:$0xff] %vm351_vm1, %v1050_v29 }
 0x211   : > { %1645 = vst.msk [vmem:[%s1998_s8 + $0x1d8] sm:$0xff] %vm351_vm1, %v1052_v37  ;;  %1295 = vrot.lane.b32.xlu0 %v2066_v57, %s1862_s22 }
 0x212   : > { %1297 = vrot.lane.b32.xlu1 %v2060_v54, %s1862_s22 }
 0x213   : > { %v1147_v46 = vpop.permute.xlu0 %1146 }
 0x214   : > { %v1149_v41 = vpop.permute.xlu1 %1148  ;;  %1660 = vst.msk [vmem:[%s2312_s15 + $0x150] sm:$0xff] %vm351_vm1, %v1147_v46 }
 0x215   : > { %1661 = vst.msk [vmem:[%s2312_s15 + $0x158] sm:$0xff] %vm351_vm1, %v1149_v41  ;;  %1299 = vrot.lane.b32.xlu0 %v2094_v1, %s1862_s22 }
 0x216   : > { %1301 = vrot.lane.b32.xlu1 %v2088_v62, %s1862_s22 }
 0x217   : > { %v1179_v54 = vpop.permute.xlu0 %1178 }
 0x218   : > { %v1181_v49 = vpop.permute.xlu1 %1180  ;;  %1676 = vst.msk [vmem:[%s2312_s15 + $0x1d0] sm:$0xff] %vm351_vm1, %v1179_v54 }
 0x219   : > { %1677 = vst.msk [vmem:[%s2312_s15 + $0x1d8] sm:$0xff] %vm351_vm1, %v1181_v49  ;;  %1303 = vrot.lane.b32.xlu0 %v2122_v9, %s1862_s22 }
 0x21a   : > { %1305 = vrot.lane.b32.xlu1 %v2116_v6, %s1862_s22 }
 0x21b   : > { %v766_v62 = vpop.permute.xlu0 %765 }
 0x21c   : > { %v768_v57 = vpop.permute.xlu1 %767  ;;  %849 = vst.msk [vmem:[%s2312_s15 + $0x60] sm:$0xff] %vm351_vm1, %v766_v62 }
 0x21d   : > { %850 = vst.msk [vmem:[%s2312_s15 + $0x68] sm:$0xff] %vm351_vm1, %v768_v57  ;;  %1307 = vrot.lane.b32.xlu0 %v2172_v17, %s1862_s22 }
 0x21e   : > { %1309 = vrot.lane.b32.xlu1 %v2169_v15, %s1862_s22 }
 0x21f   : > { %v798_v6 = vpop.permute.xlu0 %797 }
 0x220   : > { %v800_v1 = vpop.permute.xlu1 %799  ;;  %865 = vst.msk [vmem:[%s2312_s15 + $0xe0] sm:$0xff] %vm351_vm1, %v798_v6 }
 0x221   : > { %866 = vst.msk [vmem:[%s2312_s15 + $0xe8] sm:$0xff] %vm351_vm1, %v800_v1  ;;  %1311 = vrot.lane.b32.xlu0 %v2228_v25, %s1862_s22 }
 0x222   : > { %1313 = vrot.lane.b32.xlu1 %v2225_v23, %s1862_s22 }
 0x223   : > { %v894_v15 = vpop.permute.xlu0 %893 }
 0x224   : > { %v896_v9 = vpop.permute.xlu1 %895  ;;  %977 = vst.msk [vmem:[%s2326_s18 + $0x60] sm:$0xff] %vm351_vm1, %v894_v15 }
 0x225   : > { %978 = vst.msk [vmem:[%s2326_s18 + $0x68] sm:$0xff] %vm351_vm1, %v896_v9  ;;  %1315 = vrot.lane.b32.xlu0 %v2284_v34, %s1862_s22 }
 0x226   : > { %1317 = vrot.lane.b32.xlu1 %v2281_v31, %s1862_s22 }
 0x227   : > { %v926_v23 = vpop.permute.xlu0 %925 }
 0x228   : > { %v928_v17 = vpop.permute.xlu1 %927  ;;  %993 = vst.msk [vmem:[%s2326_s18 + $0xe0] sm:$0xff] %vm351_vm1, %v926_v23 }
 0x229   : > { %994 = vst.msk [vmem:[%s2326_s18 + $0xe8] sm:$0xff] %vm351_vm1, %v928_v17 }
 0x22b   : > { %v1022_v55 = vpop.permute.xlu0 %1021 }
 0x22c   : > { %v1024_v25 = vpop.permute.xlu1 %1023  ;;  %1630 = vst.msk [vmem:[%s1998_s8 + $0x160] sm:$0xff] %vm351_vm1, %v1022_v55 }
 0x22d   : > { %1631 = vst.msk [vmem:[%s1998_s8 + $0x168] sm:$0xff] %vm351_vm1, %v1024_v25 }
 0x22f   : > { %v1054_v58 = vpop.permute.xlu0 %1053 }
 0x230   : > { %v1056_v31 = vpop.permute.xlu1 %1055  ;;  %1646 = vst.msk [vmem:[%s1998_s8 + $0x1e0] sm:$0xff] %vm351_vm1, %v1054_v58 }
 0x231   : > { %1647 = vst.msk [vmem:[%s1998_s8 + $0x1e8] sm:$0xff] %vm351_vm1, %v1056_v31 }
 0x233   : > { %v1151_v59 = vpop.permute.xlu0 %1150 }
 0x234   : > { %v1153_v34 = vpop.permute.xlu1 %1152  ;;  %1662 = vst.msk [vmem:[%s2312_s15 + $0x160] sm:$0xff] %vm351_vm1, %v1151_v59 }
 0x235   : > { %1663 = vst.msk [vmem:[%s2312_s15 + $0x168] sm:$0xff] %vm351_vm1, %v1153_v34 }
 0x237   : > { %v1183_v63 = vpop.permute.xlu0 %1182 }
 0x238   : > { %v1185_v61 = vpop.permute.xlu1 %1184  ;;  %1678 = vst.msk [vmem:[%s2312_s15 + $0x1e0] sm:$0xff] %vm351_vm1, %v1183_v63 }
 0x239   : > { %1679 = vst.msk [vmem:[%s2312_s15 + $0x1e8] sm:$0xff] %vm351_vm1, %v1185_v61 }
 0x23b   : > { %v770_v3 = vpop.permute.xlu0 %769 }
 0x23c   : > { %v772_v2 = vpop.permute.xlu1 %771  ;;  %851 = vst.msk [vmem:[%s2312_s15 + $0x70] sm:$0xff] %vm351_vm1, %v770_v3 }
 0x23d   : > { %852 = vst.msk [vmem:[%s2312_s15 + $0x78] sm:$0xff] %vm351_vm1, %v772_v2 }
 0x23f   : > { %v802_v7 = vpop.permute.xlu0 %801 }
 0x240   : > { %v804_v5 = vpop.permute.xlu1 %803  ;;  %867 = vst.msk [vmem:[%s2312_s15 + $0xf0] sm:$0xff] %vm351_vm1, %v802_v7 }
 0x241   : > { %868 = vst.msk [vmem:[%s2312_s15 + $0xf8] sm:$0xff] %vm351_vm1, %v804_v5 }
 0x243   : > { %v898_v12 = vpop.permute.xlu0 %897 }
 0x244   : > { %v900_v10 = vpop.permute.xlu1 %899  ;;  %979 = vst.msk [vmem:[%s2326_s18 + $0x70] sm:$0xff] %vm351_vm1, %v898_v12 }
 0x245   : > { %980 = vst.msk [vmem:[%s2326_s18 + $0x78] sm:$0xff] %vm351_vm1, %v900_v10 }
 0x247   : > { %v930_v16 = vpop.permute.xlu0 %929 }
 0x248   : > { %v932_v14 = vpop.permute.xlu1 %931  ;;  %995 = vst.msk [vmem:[%s2326_s18 + $0xf0] sm:$0xff] %vm351_vm1, %v930_v16 }
 0x249   : > { %996 = vst.msk [vmem:[%s2326_s18 + $0xf8] sm:$0xff] %vm351_vm1, %v932_v14 }
 0x24b   : > { %v1026_v20 = vpop.permute.xlu0 %1025 }
 0x24c   : > { %v1028_v18 = vpop.permute.xlu1 %1027  ;;  %1632 = vst.msk [vmem:[%s1998_s8 + $0x170] sm:$0xff] %vm351_vm1, %v1026_v20 }
 0x24d   : > { %1633 = vst.msk [vmem:[%s1998_s8 + $0x178] sm:$0xff] %vm351_vm1, %v1028_v18 }
 0x24f   : > { %v1058_v24 = vpop.permute.xlu0 %1057 }
 0x250   : > { %v1060_v22 = vpop.permute.xlu1 %1059  ;;  %1648 = vst.msk [vmem:[%s1998_s8 + $0x1f0] sm:$0xff] %vm351_vm1, %v1058_v24 }
 0x251   : > { %1649 = vst.msk [vmem:[%s1998_s8 + $0x1f8] sm:$0xff] %vm351_vm1, %v1060_v22 }
 0x253   : > { %v1155_v28 = vpop.permute.xlu0 %1154 }
 0x254   : > { %v1157_v26 = vpop.permute.xlu1 %1156  ;;  %1664 = vst.msk [vmem:[%s2312_s15 + $0x170] sm:$0xff] %vm351_vm1, %v1155_v28 }
 0x255   : > { %1665 = vst.msk [vmem:[%s2312_s15 + $0x178] sm:$0xff] %vm351_vm1, %v1157_v26 }
 0x257   : > { %v1187_v32 = vpop.permute.xlu0 %1186 }
 0x258   : > { %v1189_v30 = vpop.permute.xlu1 %1188  ;;  %1680 = vst.msk [vmem:[%s2312_s15 + $0x1f0] sm:$0xff] %vm351_vm1, %v1187_v32 }
 0x259   : > { %1681 = vst.msk [vmem:[%s2312_s15 + $0x1f8] sm:$0xff] %vm351_vm1, %v1189_v30 }
 0x25b   : > { %v1256_v35 = vpop.permute.xlu0 %1255 }
 0x25c   : > { %v1258_v33 = vpop.permute.xlu1 %1257  ;;  %1682 = vst.msk [vmem:[%s2326_s18 + $0x100] sm:$0xff] %vm351_vm1, %v1256_v35 }
 0x25d   : > { %1683 = vst.msk [vmem:[%s2326_s18 + $0x108] sm:$0xff] %vm351_vm1, %v1258_v33 }
 0x25f   : > { %v1260_v39 = vpop.permute.xlu0 %1259 }
 0x260   : > { %v1262_v38 = vpop.permute.xlu1 %1261  ;;  %1684 = vst.msk [vmem:[%s2326_s18 + $0x110] sm:$0xff] %vm351_vm1, %v1260_v39 }
 0x261   : > { %1685 = vst.msk [vmem:[%s2326_s18 + $0x118] sm:$0xff] %vm351_vm1, %v1262_v38 }
 0x263   : > { %v1264_v43 = vpop.permute.xlu0 %1263 }
 0x264   : > { %v1266_v42 = vpop.permute.xlu1 %1265  ;;  %1686 = vst.msk [vmem:[%s2326_s18 + $0x120] sm:$0xff] %vm351_vm1, %v1264_v43 }
 0x265   : > { %1687 = vst.msk [vmem:[%s2326_s18 + $0x128] sm:$0xff] %vm351_vm1, %v1266_v42 }
 0x267   : > { %v1268_v47 = vpop.permute.xlu0 %1267 }
 0x268   : > { %v1270_v45 = vpop.permute.xlu1 %1269  ;;  %1688 = vst.msk [vmem:[%s2326_s18 + $0x130] sm:$0xff] %vm351_vm1, %v1268_v47 }
 0x269   : > { %1689 = vst.msk [vmem:[%s2326_s18 + $0x138] sm:$0xff] %vm351_vm1, %v1270_v45 }
 0x26b   : > { %v1272_v51 = vpop.permute.xlu0 %1271 }
 0x26c   : > { %v1274_v50 = vpop.permute.xlu1 %1273  ;;  %1690 = vst.msk [vmem:[%s2326_s18 + $0x140] sm:$0xff] %vm351_vm1, %v1272_v51 }
 0x26d   : > { %1691 = vst.msk [vmem:[%s2326_s18 + $0x148] sm:$0xff] %vm351_vm1, %v1274_v50 }
 0x26f   : > { %v1276_v53 = vpop.permute.xlu0 %1275 }
 0x270   : > { %v1278_v36 = vpop.permute.xlu1 %1277  ;;  %1692 = vst.msk [vmem:[%s2326_s18 + $0x150] sm:$0xff] %vm351_vm1, %v1276_v53 }
 0x271   : > { %1693 = vst.msk [vmem:[%s2326_s18 + $0x158] sm:$0xff] %vm351_vm1, %v1278_v36 }
 0x273   : > { %v1280_v44 = vpop.permute.xlu0 %1279 }
 0x274   : > { %v1282_v40 = vpop.permute.xlu1 %1281  ;;  %1694 = vst.msk [vmem:[%s2326_s18 + $0x160] sm:$0xff] %vm351_vm1, %v1280_v44 }
 0x275   : > { %1695 = vst.msk [vmem:[%s2326_s18 + $0x168] sm:$0xff] %vm351_vm1, %v1282_v40 }
 0x277   : > { %v1284_v52 = vpop.permute.xlu0 %1283 }
 0x278   : > { %v1286_v48 = vpop.permute.xlu1 %1285  ;;  %1696 = vst.msk [vmem:[%s2326_s18 + $0x170] sm:$0xff] %vm351_vm1, %v1284_v52 }
 0x279   : > { %1697 = vst.msk [vmem:[%s2326_s18 + $0x178] sm:$0xff] %vm351_vm1, %v1286_v48 }
 0x27b   : > { %v1288_v60 = vpop.permute.xlu0 %1287 }
 0x27c   : > { %v1290_v56 = vpop.permute.xlu1 %1289  ;;  %1698 = vst.msk [vmem:[%s2326_s18 + $0x180] sm:$0xff] %vm351_vm1, %v1288_v60 }
 0x27d   : > { %1699 = vst.msk [vmem:[%s2326_s18 + $0x188] sm:$0xff] %vm351_vm1, %v1290_v56 }
 0x27f   : > { %v1292_v4 = vpop.permute.xlu0 %1291 }
 0x280   : > { %v1294_v0 = vpop.permute.xlu1 %1293  ;;  %1700 = vst.msk [vmem:[%s2326_s18 + $0x190] sm:$0xff] %vm351_vm1, %v1292_v4 }
 0x281   : > { %1701 = vst.msk [vmem:[%s2326_s18 + $0x198] sm:$0xff] %vm351_vm1, %v1294_v0 }
 0x283   : > { %v1296_v11 = vpop.permute.xlu0 %1295 }
 0x284   : > { %v1298_v8 = vpop.permute.xlu1 %1297  ;;  %1702 = vst.msk [vmem:[%s2326_s18 + $0x1a0] sm:$0xff] %vm351_vm1, %v1296_v11 }
 0x285   : > { %1703 = vst.msk [vmem:[%s2326_s18 + $0x1a8] sm:$0xff] %vm351_vm1, %v1298_v8 }
 0x287   : > { %v1300_v19 = vpop.permute.xlu0 %1299 }
 0x288   : > { %v1302_v13 = vpop.permute.xlu1 %1301  ;;  %1704 = vst.msk [vmem:[%s2326_s18 + $0x1b0] sm:$0xff] %vm351_vm1, %v1300_v19 }
 0x289   : > { %1705 = vst.msk [vmem:[%s2326_s18 + $0x1b8] sm:$0xff] %vm351_vm1, %v1302_v13 }
 0x28b   : > { %v1304_v27 = vpop.permute.xlu0 %1303 }
 0x28c   : > { %v1306_v21 = vpop.permute.xlu1 %1305  ;;  %1706 = vst.msk [vmem:[%s2326_s18 + $0x1c0] sm:$0xff] %vm351_vm1, %v1304_v27 }
 0x28d   : > { %1707 = vst.msk [vmem:[%s2326_s18 + $0x1c8] sm:$0xff] %vm351_vm1, %v1306_v21 }
 0x28f   : > { %v1308_v29 = vpop.permute.xlu0 %1307 }
 0x290   : > { %v1310_v37 = vpop.permute.xlu1 %1309  ;;  %1708 = vst.msk [vmem:[%s2326_s18 + $0x1d0] sm:$0xff] %vm351_vm1, %v1308_v29 }
 0x291   : > { %1709 = vst.msk [vmem:[%s2326_s18 + $0x1d8] sm:$0xff] %vm351_vm1, %v1310_v37 }
 0x293   : > { %v1312_v46 = vpop.permute.xlu0 %1311 }
 0x294   : > { %v1314_v41 = vpop.permute.xlu1 %1313  ;;  %1710 = vst.msk [vmem:[%s2326_s18 + $0x1e0] sm:$0xff] %vm351_vm1, %v1312_v46 }
 0x295   : > { %1711 = vst.msk [vmem:[%s2326_s18 + $0x1e8] sm:$0xff] %vm351_vm1, %v1314_v41 }
 0x297   : > { %v1316_v54 = vpop.permute.xlu0 %1315 }
 0x298   : > { %v1318_v49 = vpop.permute.xlu1 %1317  ;;  %1712 = vst.msk [vmem:[%s2326_s18 + $0x1f0] sm:$0xff] %vm351_vm1, %v1316_v54 }
 0x299   : > { %1713 = vst.msk [vmem:[%s2326_s18 + $0x1f8] sm:$0xff] %vm351_vm1, %v1318_v49 }
 0x29a PF: > { %s16_s20 = sadd.s32 1, %s1856_s20   ;;  %s2859_s18 = smov %s1852_s19 }
 0x29b   : > { %p13_p5 = scmp.ge.s32.totalorder %s16_s20, 4   ;;  %s2860_s19 = smov %s2862_s21 }
 0x29d   :  { %15 = sbr.rel (!%p13_p5) target bundleno = 2 (0x2), region = 89 }

</bundles_post_ra>
